<compile_context>
chip_gen: v7x
topology: tpu7x:2x2x1
jax: 0.10.0
libtpu: 0.0.40
codegen_flags: <defaults>
</compile_context>

<pallas_src>
import math
from functools import partial

import numpy as np
import jax
import jax.numpy as jnp
from jax import lax
from jax.experimental import pallas as pl
from jax.experimental.pallas import tpu as pltpu


def _round_up(x, m):
    return ((x + m - 1) // m) * m


def _pick_batch_fold(B, max_fold=8):
    """Largest divisor of B that is <= max_fold while keeping >= 2 grid steps
    (so both v7x TensorCores stay busy when B >= 2)."""
    best = 1
    for bb in range(1, min(B, max_fold) + 1):
        if B % bb == 0 and (B == 1 or B // bb >= 2):
            best = bb
    return best


def _wspec(shape, index_map, single_buffer):
    """Constant-index weight block.  Such blocks never re-DMA across the grid,
    so a second pipeline buffer is pure VMEM waste (critical at real model
    sizes on v7x's 64 MiB VMEM)."""
    if single_buffer:
        return pl.BlockSpec(shape, index_map, pipeline_mode=pl.Buffered(1))
    return pl.BlockSpec(shape, index_map)


# ----------------------------------------------------------------------------
# Kernel 1: fused ln_vision -> Q-Former cross-attention -> llm_proj
#           (batch-folded: Bb frames per grid step)
# ----------------------------------------------------------------------------
def fused_vision_kernel(img_ref, g_ref, b_ref, qt_ref,
                        wq_ref, wk_ref, wv_ref, wo_ref,
                        pw_ref, pb_ref, o_ref, *, eps):
    Bb, N, C = img_ref.shape
    Nq = qt_ref.shape[1]
    H = pw_ref.shape[1]

    # fp16-safe LayerNorm computed in f32 (matches the LayerNorm subclass).
    img = img_ref[...].astype(jnp.float32)                      # (Bb, N, C)
    mean = jnp.mean(img, axis=-1, keepdims=True)
    var = jnp.mean((img - mean) ** 2, axis=-1, keepdims=True)
    img = (img - mean) * lax.rsqrt(var + eps)
    img = img * g_ref[...].astype(jnp.float32) + b_ref[...].astype(jnp.float32)
    img2d = img.astype(jnp.bfloat16).reshape(Bb * N, C)

    # TODO(synk): single cross-attention block stands in for the pretrained
    # 12-layer Q-Former BERT (text branch / tokenizer not replicated).
    # K/V projections run once on the (Bb*N, C) slab -> full MXU sublanes.
    k = jnp.dot(img2d, wk_ref[...], preferred_element_type=jnp.float32)
    v = jnp.dot(img2d, wv_ref[...], preferred_element_type=jnp.float32)
    k = k.astype(jnp.bfloat16).reshape(Bb, N, C)
    v = v.astype(jnp.bfloat16).reshape(Bb, N, C)

    # Query tokens are shared across the batch: project once, broadcast in-register.
    qt = qt_ref[0]                                              # (Nq, C) bf16
    q = jnp.dot(qt, wq_ref[...], preferred_element_type=jnp.float32)   # 1/sqrt(d) folded into wq
    q_b = jnp.broadcast_to(q.astype(jnp.bfloat16)[None], (Bb, Nq, C))

    s = jnp.einsum('bqd,bkd->bqk', q_b, k, preferred_element_type=jnp.float32)
    s = s - jnp.max(s, axis=-1, keepdims=True)
    p = jnp.exp(s)
    p = p * pl.reciprocal(jnp.sum(p, axis=-1, keepdims=True), approx=True)

    ctx = jnp.einsum('bqk,bkd->bqd', p.astype(jnp.bfloat16), v,
                     preferred_element_type=jnp.float32)        # (Bb, Nq, C)
    attn = jnp.dot(ctx.astype(jnp.bfloat16).reshape(Bb * Nq, C), wo_ref[...],
                   preferred_element_type=jnp.float32).reshape(Bb, Nq, C)
    attn = attn + qt.astype(jnp.float32)[None]                  # residual

    # llm_proj fused in: (Q-Former hidden) -> (LLM hidden), still in-register.
    proj = jnp.dot(attn.astype(jnp.bfloat16).reshape(Bb * Nq, C), pw_ref[...],
                   preferred_element_type=jnp.float32) + pb_ref[...].astype(jnp.float32)
    o_ref[...] = proj.reshape(Bb, Nq, H).astype(o_ref.dtype)


def vision_to_llm_tokens(image_embeds, ln_g, ln_b, query_tokens,
                         wq, wk, wv, wo, proj_w, proj_b, eps=1e-5):
    B, N, C = image_embeds.shape
    Nq = query_tokens.shape[1]
    H = proj_w.shape[1]
    Bb = _pick_batch_fold(B)
    n_steps = B // Bb

    flops = 2 * (2 * B * N * C * C + n_steps * Nq * C * C
                 + 2 * B * Nq * N * C + B * Nq * C * C + B * Nq * C * H)
    bytes_accessed = (B * N * C + B * Nq * H + Nq * C + 4 * C * C + C * H) * 2 \
                     + (2 * C + H) * 4
    cost = pl.CostEstimate(flops=int(flops), transcendentals=int(B * Nq * N),
                           bytes_accessed=int(bytes_accessed))

    def call(single_buffer):
        c2 = lambda i: (0, 0)
        c3 = lambda i: (0, 0, 0)
        return pl.pallas_call(
            partial(fused_vision_kernel, eps=eps),
            out_shape=jax.ShapeDtypeStruct((B, Nq, H), jnp.bfloat16),
            grid=(n_steps,),
            in_specs=[
                pl.BlockSpec((Bb, N, C), lambda i: (i, 0, 0)),
                _wspec((1, C), c2, single_buffer),
                _wspec((1, C), c2, single_buffer),
                _wspec((1, Nq, C), c3, single_buffer),   # constant query-token block
                _wspec((C, C), c2, single_buffer),
                _wspec((C, C), c2, single_buffer),
                _wspec((C, C), c2, single_buffer),
                _wspec((C, C), c2, single_buffer),
                _wspec((C, H), c2, single_buffer),
                _wspec((1, H), c2, single_buffer),
            ],
            out_specs=pl.BlockSpec((Bb, Nq, H), lambda i: (i, 0, 0)),
            compiler_params=pltpu.CompilerParams(
                dimension_semantics=("parallel",),
                vmem_limit_bytes=64 * 1024 * 1024),
            cost_estimate=cost,
        )(image_embeds, ln_g, ln_b, query_tokens, wq, wk, wv, wo, proj_w, proj_b)

    try:
        return call(hasattr(pl, "Buffered"))
    except Exception:
        # TODO(synk): Buffered(1) not supported on this jax build; fall back to
        # default double-buffered constant weights.
        return call(False)


# ----------------------------------------------------------------------------
# Kernel 2: fused wp-row gather -> waypoints_predictor MLP -> masked L1 loss
# ----------------------------------------------------------------------------
def wp_head_loss_kernel(idx_ref, hid_hbm, w1_ref, b1_ref, w2_ref, b2_ref, gt_ref,
                        loss_ref, buf_ref, sem_ref, *, n_valid):
    M_pad, H = buf_ref.shape
    Dout = w2_ref.shape[1]

    # Gather the wp-target token rows straight from the LLM hidden-state tensor
    # in HBM (no XLA gather / padded HBM intermediate).  M_pad is small, so the
    # per-row DMAs are issued in one unrolled burst and then waited.
    for m in range(M_pad):
        pltpu.make_async_copy(hid_hbm.at[pl.ds(idx_ref[m], 1), :],
                              buf_ref.at[pl.ds(m, 1), :],
                              sem_ref.at[m]).start()
    for m in range(M_pad):
        pltpu.make_async_copy(hid_hbm.at[pl.ds(idx_ref[m], 1), :],
                              buf_ref.at[pl.ds(m, 1), :],
                              sem_ref.at[m]).wait()

    x = buf_ref[...]                                            # (M_pad, H) bf16
    # waypoints_predictor: Linear -> ReLU -> Linear.  bf16 MXU operands with
    # f32 accumulation (reference MLP is fp16/f32 -> ~1e-2 rel deviation).
    h = jnp.dot(x, w1_ref[...], preferred_element_type=jnp.float32)
    h = jnp.maximum(h + b1_ref[...].astype(jnp.float32), 0.0)
    pred = jnp.dot(h.astype(jnp.bfloat16), w2_ref[...],
                   preferred_element_type=jnp.float32) + b2_ref[...].astype(jnp.float32)

    # L1-loss epilogue.  Output lanes >= 10 are exactly zero in both pred
    # (zero-padded weight/bias columns) and gt; padded rows are masked out.
    diff = jnp.abs(pred - gt_ref[...].astype(jnp.float32))
    row_mask = (lax.broadcasted_iota(jnp.int32, (M_pad, Dout), 0) < n_valid
                ).astype(jnp.float32)
    loss_ref[0, 0] = jnp.sum(diff * row_mask) * (1.0 / float(n_valid * 10))


def wp_head_and_loss(hidden_flat, flat_idx, gt_waypoints, w1, b1, w2p, b2p):
    R, H = hidden_flat.shape
    Dout = w2p.shape[1]
    M = int(flat_idx.shape[0])
    M_pad = _round_up(max(M, 1), 8)

    idx_pad = np.zeros((M_pad,), np.int32)
    idx_pad[:M] = np.asarray(flat_idx, np.int32)     # padded slots re-read row idx 0 (masked in loss)
    gt_pad = jnp.zeros((M_pad, Dout), jnp.float32)
    gt_pad = gt_pad.at[:M, :gt_waypoints.shape[1]].set(gt_waypoints.astype(jnp.float32))

    cost = pl.CostEstimate(
        flops=int(2 * M_pad * H * H + 2 * M_pad * H * Dout),
        transcendentals=0,
        bytes_accessed=int(M_pad * H * 2 + (H * H + H * Dout) * 2
                           + (H + Dout) * 4 + M_pad * Dout * 4 + 4))

    def call(single_buffer):
        c2 = lambda i, idx: (0, 0)
        loss = pl.pallas_call(
            partial(wp_head_loss_kernel, n_valid=M),
            out_shape=jax.ShapeDtypeStruct((1, 1), jnp.float32),
            grid_spec=pltpu.PrefetchScalarGridSpec(
                num_scalar_prefetch=1,           # flat row indices -> SMEM
                grid=(1,),
                in_specs=[
                    pl.BlockSpec(memory_space=pl.ANY),          # hidden states stay in HBM
                    _wspec((H, H), c2, single_buffer),          # w1: 32 MiB bf16 at H=4k
                    _wspec((1, H), c2, single_buffer),
                    _wspec((H, Dout), c2, single_buffer),
                    _wspec((1, Dout), c2, single_buffer),
                    pl.BlockSpec((M_pad, Dout), c2),            # padded gt waypoints
                ],
                out_specs=pl.BlockSpec(memory_space=pltpu.MemorySpace.SMEM),
                scratch_shapes=[
                    pltpu.VMEM((M_pad, H), hidden_flat.dtype),  # gathered rows
                    pltpu.SemaphoreType.DMA((M_pad,)),
                ]),
            compiler_params=pltpu.CompilerParams(
                dimension_semantics=("arbitrary",),
                vmem_limit_bytes=64 * 1024 * 1024),
            cost_estimate=cost,
        )(jnp.asarray(idx_pad), hidden_flat, w1, b1, w2p, b2p, gt_pad)
        return loss[0, 0]

    try:
        return call(hasattr(pl, "Buffered"))
    except Exception:
        return call(False)


# ----------------------------------------------------------------------------
# Forward-pass glue (mirrors Memfuser_Edge_Server.forward semantics)
# ----------------------------------------------------------------------------
def concat_text_image_input(input_embeds, input_atts_np, image_embeds,
                            image_nums, end_flag_pos_list):
    # TODO(synk): data-dependent host-side assembly (mirrors the reference
    # torch.cat loop); lengths are known on the host from the numpy atts.
    bs, t, n, dim = image_embeds.shape
    llm_inputs, llm_attention_mask = [], []
    input_part_targets_len, wp_target_index = [], []
    for i in range(bs):
        ones_i = int(input_atts_np[i].sum())
        input_part_targets_len.append(ones_i)
        llm_inputs.append(jnp.concatenate(
            [input_embeds[i, :ones_i],
             image_embeds[i].reshape(t * n, dim),
             input_embeds[i, ones_i:]], axis=0))
        llm_attention_mask.append(np.concatenate(
            [input_atts_np[i, :ones_i],
             np.ones(image_nums[i] * n, np.int32),
             np.zeros((t - image_nums[i]) * n, np.int32),
             input_atts_np[i, ones_i:]]))
        for j in end_flag_pos_list[i]:
            wp_target_index.append([i, j + ones_i])
    return (jnp.stack(llm_inputs, 0),
            np.stack(llm_attention_mask, 0),
            input_part_targets_len,
            np.asarray(wp_target_index, np.int32))


def build_gt_waypoints(waypoints, valid_frames):
    gt = [waypoints[i, :valid_frames[i]] for i in range(waypoints.shape[0])]
    return jnp.concatenate(gt, axis=0)


def memfuser_edge_server_forward(params, x):
    bs_llm, t = x["bs_llm"], x["t"]
    image_embeds = x["image_embeds"]                            # (bs_llm*t, N_img, C) bf16

    # ln_vision + Q-Former cross-attention + llm_proj: one fused Pallas kernel.
    llm_img_tokens = vision_to_llm_tokens(
        image_embeds, params["ln_g"], params["ln_b"], params["query_tokens"],
        params["q_wq"], params["q_wk"], params["q_wv"], params["q_wo"],
        params["llm_proj_w"], params["llm_proj_b"])
    _, Nq, H = llm_img_tokens.shape
    image_embeds_llm = llm_img_tokens.reshape(bs_llm, t, Nq, H)

    # end-flag positions (use_extra_prompt == False branch)
    end_flag_pos_list = [[Nq * (j + 1) - 1 for j in range(x["valid_frames"][i])]
                         for i in range(bs_llm)]

    # TODO(synk): LLaMA tokenizer + embedding table not replicated; deterministic
    # synthetic token embeddings / attention mask are provided in x.
    inputs_embeds = x["text_embeds"]                            # (bs_llm, L, H) bf16
    input_atts = x["text_atts"]                                 # numpy (bs_llm, L)

    llm_inputs, llm_attention_mask, _, wp_target_index = concat_text_image_input(
        inputs_embeds, input_atts, image_embeds_llm, x["valid_frames"], end_flag_pos_list)

    # TODO(synk): pretrained LoRA-wrapped LLaMA/OPT decoder stack not replicated;
    # hidden_states is the assembled llm_inputs passthrough.
    hidden_states = llm_inputs                                  # (bs_llm, n_tokens, H)
    del llm_attention_mask

    bsz, n_tokens, H = hidden_states.shape
    flat_idx = wp_target_index[:, 0] * n_tokens + wp_target_index[:, 1]  # host-known numpy
    hidden_flat = hidden_states.reshape(bsz * n_tokens, H)

    gt_waypoints = build_gt_waypoints(x["local_future_waypoints"], x["valid_frames"])

    # NOTE: the reference also runs end_predictor, but its output never feeds
    # the returned loss -> dropped (dead compute).
    return wp_head_and_loss(hidden_flat, flat_idx, gt_waypoints,
                            params["wp_w1"], params["wp_b1"],
                            params["wp_w2_pad"], params["wp_b2_pad"])


# ----------------------------------------------------------------------------
# Deterministic parameter / input construction
# ----------------------------------------------------------------------------
def make_params(key, C, Nq, H):
    ks = jax.random.split(key, 16)

    def nrm(k, s, sc=0.05, dt=jnp.bfloat16):
        return (sc * jax.random.normal(k, s)).astype(dt)

    # waypoints_predictor second Linear: output lanes padded to 128 so the
    # kernel's stores stay lane-dense; padded weight/bias columns are zero.
    wp_w2 = 0.05 * jax.random.normal(ks[11], (H, 10))
    wp_w2_pad = jnp.zeros((H, 128), jnp.float32).at[:, :10].set(wp_w2).astype(jnp.bfloat16)
    wp_b2 = 0.01 * jax.random.normal(ks[12], (10,))
    wp_b2_pad = jnp.zeros((1, 128), jnp.float32).at[0, :10].set(wp_b2)

    # attention 1/sqrt(d) scale folded into wq on the host (saves a VPU pass
    # over the score tile every grid step).
    q_wq = (0.05 * jax.random.normal(ks[3], (C, C)) / math.sqrt(C)).astype(jnp.bfloat16)

    return dict(
        ln_g=jnp.ones((1, C), jnp.float32),
        ln_b=nrm(ks[1], (1, C), 0.01, jnp.float32),
        query_tokens=nrm(ks[2], (1, Nq, C), 0.02),
        q_wq=q_wq,
        q_wk=nrm(ks[4], (C, C)), q_wv=nrm(ks[5], (C, C)), q_wo=nrm(ks[6], (C, C)),
        llm_proj_w=nrm(ks[7], (C, H)), llm_proj_b=nrm(ks[8], (1, H), 0.01, jnp.float32),
        wp_w1=nrm(ks[9], (H, H)), wp_b1=nrm(ks[10], (1, H), 0.01, jnp.float32),
        wp_w2_pad=wp_w2_pad, wp_b2_pad=wp_b2_pad,
    )


if __name__ == "__main__":
    key = jax.random.PRNGKey(0)
    bs_llm, t = 2, 2
    N_img, C = 16, 128       # vision tokens per frame, num_features (lane-aligned)
    Nq, H = 8, 128           # Q-Former query tokens, LLM hidden size
    L = 8                    # text length

    kp, k1, k2, k3 = jax.random.split(key, 4)
    params = make_params(kp, C, Nq, H)

    x = {
        "bs_llm": bs_llm,
        "t": t,
        "valid_frames": [2, 1],
        "image_embeds": jax.random.normal(k1, (bs_llm * t, N_img, C)).astype(jnp.bfloat16),
        "text_embeds": (0.05 * jax.random.normal(k2, (bs_llm, L, H))).astype(jnp.bfloat16),
        "text_atts": np.array([[1, 1, 1, 1, 1, 0, 0, 0],
                               [1, 1, 1, 1, 1, 1, 1, 1]], np.int32),
        "local_future_waypoints": jax.random.normal(k3, (bs_llm, t, 10)).astype(jnp.float32),
    }

    loss = memfuser_edge_server_forward(params, x)
    loss = jax.block_until_ready(loss)
    assert jnp.isfinite(loss)
    print("KERNEL_OK")
</pallas_src>

<mosaic_0001>
module attributes {stable_mosaic.version = 11 : i64} {
  func.func @fused_vision_kernel(%arg0: i32, %arg1: memref<2x16x128xbf16, #tpu.memory_space<vmem>>, %arg2: memref<1x128xf32, #tpu.memory_space<vmem>>, %arg3: memref<1x128xf32, #tpu.memory_space<vmem>>, %arg4: memref<1x8x128xbf16, #tpu.memory_space<vmem>>, %arg5: memref<128x128xbf16, #tpu.memory_space<vmem>>, %arg6: memref<128x128xbf16, #tpu.memory_space<vmem>>, %arg7: memref<128x128xbf16, #tpu.memory_space<vmem>>, %arg8: memref<128x128xbf16, #tpu.memory_space<vmem>>, %arg9: memref<128x128xbf16, #tpu.memory_space<vmem>>, %arg10: memref<1x128xf32, #tpu.memory_space<vmem>>, %arg11: memref<2x8x128xbf16, #tpu.memory_space<vmem>>) attributes {dimension_semantics = [#tpu.dimension_semantics<parallel>], iteration_bounds = array<i64: 2>, scalar_prefetch = 0 : i64, scratch_operands = 0 : i64, tpu.core_type = #tpu.core_type<tc>, window_params = [{transform_indices = @transform_0, window_bounds = array<i64: 2, 16, 128>}, {pipeline_mode = #tpu.pipeline_mode<synchronous>, transform_indices = @transform_1, window_bounds = array<i64: 1, 128>}, {pipeline_mode = #tpu.pipeline_mode<synchronous>, transform_indices = @transform_2, window_bounds = array<i64: 1, 128>}, {pipeline_mode = #tpu.pipeline_mode<synchronous>, transform_indices = @transform_3, window_bounds = array<i64: 1, 8, 128>}, {pipeline_mode = #tpu.pipeline_mode<synchronous>, transform_indices = @transform_4, window_bounds = array<i64: 128, 128>}, {pipeline_mode = #tpu.pipeline_mode<synchronous>, transform_indices = @transform_5, window_bounds = array<i64: 128, 128>}, {pipeline_mode = #tpu.pipeline_mode<synchronous>, transform_indices = @transform_6, window_bounds = array<i64: 128, 128>}, {pipeline_mode = #tpu.pipeline_mode<synchronous>, transform_indices = @transform_7, window_bounds = array<i64: 128, 128>}, {pipeline_mode = #tpu.pipeline_mode<synchronous>, transform_indices = @transform_8, window_bounds = array<i64: 128, 128>}, {pipeline_mode = #tpu.pipeline_mode<synchronous>, transform_indices = @transform_9, window_bounds = array<i64: 1, 128>}, {transform_indices = @transform_10, window_bounds = array<i64: 2, 8, 128>}]} {
    %c0 = arith.constant 0 : index
    %c0_0 = arith.constant 0 : index
    %c0_1 = arith.constant 0 : index
    %0 = vector.load %arg1[%c0, %c0_0, %c0_1] : memref<2x16x128xbf16, #tpu.memory_space<vmem>>, vector<2x16x128xbf16>
    %1 = arith.extf %0 : vector<2x16x128xbf16> to vector<2x16x128xf32>
    %cst = arith.constant dense<0.000000e+00> : vector<2x16xf32>
    %2 = vector.multi_reduction <add>, %1, %cst [2] : vector<2x16x128xf32> to vector<2x16xf32>
    %3 = vector.shape_cast %2 : vector<2x16xf32> to vector<2x16x1xf32>
    %cst_2 = arith.constant 1.280000e+02 : f32
    %4 = vector.broadcast %cst_2 : f32 to vector<2x16x1xf32>
    %5 = arith.divf %3, %4 : vector<2x16x1xf32>
    %6 = vector.broadcast %5 : vector<2x16x1xf32> to vector<2x16x128xf32>
    %7 = arith.subf %1, %6 : vector<2x16x128xf32>
    %8 = arith.mulf %7, %7 : vector<2x16x128xf32>
    %cst_3 = arith.constant dense<0.000000e+00> : vector<2x16xf32>
    %9 = vector.multi_reduction <add>, %8, %cst_3 [2] : vector<2x16x128xf32> to vector<2x16xf32>
    %10 = vector.shape_cast %9 : vector<2x16xf32> to vector<2x16x1xf32>
    %cst_4 = arith.constant 1.280000e+02 : f32
    %11 = vector.broadcast %cst_4 : f32 to vector<2x16x1xf32>
    %12 = arith.divf %10, %11 : vector<2x16x1xf32>
    %13 = vector.broadcast %5 : vector<2x16x1xf32> to vector<2x16x128xf32>
    %14 = arith.subf %1, %13 : vector<2x16x128xf32>
    %cst_5 = arith.constant 9.99999974E-6 : f32
    %15 = vector.broadcast %cst_5 : f32 to vector<2x16x1xf32>
    %16 = arith.addf %12, %15 : vector<2x16x1xf32>
    %17 = math.rsqrt %16 : vector<2x16x1xf32>
    %18 = vector.broadcast %17 : vector<2x16x1xf32> to vector<2x16x128xf32>
    %19 = arith.mulf %14, %18 : vector<2x16x128xf32>
    %c0_6 = arith.constant 0 : index
    %c0_7 = arith.constant 0 : index
    %20 = vector.load %arg2[%c0_6, %c0_7] : memref<1x128xf32, #tpu.memory_space<vmem>>, vector<1x128xf32>
    %21 = vector.shape_cast %20 : vector<1x128xf32> to vector<1x1x128xf32>
    %22 = vector.broadcast %21 : vector<1x1x128xf32> to vector<2x16x128xf32>
    %23 = arith.mulf %19, %22 : vector<2x16x128xf32>
    %c0_8 = arith.constant 0 : index
    %c0_9 = arith.constant 0 : index
    %24 = vector.load %arg3[%c0_8, %c0_9] : memref<1x128xf32, #tpu.memory_space<vmem>>, vector<1x128xf32>
    %25 = vector.shape_cast %24 : vector<1x128xf32> to vector<1x1x128xf32>
    %26 = vector.broadcast %25 : vector<1x1x128xf32> to vector<2x16x128xf32>
    %27 = arith.addf %23, %26 : vector<2x16x128xf32>
    %28 = arith.truncf %27 : vector<2x16x128xf32> to vector<2x16x128xbf16>
    %29 = vector.shape_cast %28 : vector<2x16x128xbf16> to vector<32x128xbf16>
    %c0_10 = arith.constant 0 : index
    %c0_11 = arith.constant 0 : index
    %30 = vector.load %arg6[%c0_10, %c0_11] : memref<128x128xbf16, #tpu.memory_space<vmem>>, vector<128x128xbf16>
    %cst_12 = arith.constant dense<0.000000e+00> : vector<32x128xf32>
    %31 = tpu.matmul %29, %30, %cst_12 {dimension_numbers = #tpu.dot_dimension_numbers<[1], [0], [0], [1], [0, 0, 1, 1], [], []>} : vector<32x128xbf16>, vector<128x128xbf16>, vector<32x128xf32> -> vector<32x128xf32>
    %c0_13 = arith.constant 0 : index
    %c0_14 = arith.constant 0 : index
    %32 = vector.load %arg7[%c0_13, %c0_14] : memref<128x128xbf16, #tpu.memory_space<vmem>>, vector<128x128xbf16>
    %cst_15 = arith.constant dense<0.000000e+00> : vector<32x128xf32>
    %33 = tpu.matmul %29, %32, %cst_15 {dimension_numbers = #tpu.dot_dimension_numbers<[1], [0], [0], [1], [0, 0, 1, 1], [], []>} : vector<32x128xbf16>, vector<128x128xbf16>, vector<32x128xf32> -> vector<32x128xf32>
    %34 = arith.truncf %31 : vector<32x128xf32> to vector<32x128xbf16>
    %35 = vector.shape_cast %34 : vector<32x128xbf16> to vector<2x16x128xbf16>
    %36 = arith.truncf %33 : vector<32x128xf32> to vector<32x128xbf16>
    %37 = vector.shape_cast %36 : vector<32x128xbf16> to vector<2x16x128xbf16>
    %c0_16 = arith.constant 0 : index
    %c0_17 = arith.constant 0 : index
    %c0_18 = arith.constant 0 : index
    %38 = vector.load %arg4[%c0_16, %c0_17, %c0_18] : memref<1x8x128xbf16, #tpu.memory_space<vmem>>, vector<1x8x128xbf16>
    %39 = vector.shape_cast %38 : vector<1x8x128xbf16> to vector<8x128xbf16>
    %c0_19 = arith.constant 0 : index
    %c0_20 = arith.constant 0 : index
    %40 = vector.load %arg5[%c0_19, %c0_20] : memref<128x128xbf16, #tpu.memory_space<vmem>>, vector<128x128xbf16>
    %cst_21 = arith.constant dense<0.000000e+00> : vector<8x128xf32>
    %41 = tpu.matmul %39, %40, %cst_21 {dimension_numbers = #tpu.dot_dimension_numbers<[1], [0], [0], [1], [0, 0, 1, 1], [], []>} : vector<8x128xbf16>, vector<128x128xbf16>, vector<8x128xf32> -> vector<8x128xf32>
    %42 = arith.truncf %41 : vector<8x128xf32> to vector<8x128xbf16>
    %43 = vector.shape_cast %42 : vector<8x128xbf16> to vector<1x8x128xbf16>
    %44 = vector.shape_cast %43 : vector<1x8x128xbf16> to vector<1x8x128xbf16>
    %45 = vector.broadcast %44 : vector<1x8x128xbf16> to vector<2x8x128xbf16>
    "tpu.trace_start"() <{level = 10 : i32, message = "bqd,bkd->bqk"}> : () -> ()
    %cst_22 = arith.constant dense<0.000000e+00> : vector<2x8x16xf32>
    %46 = tpu.matmul %45, %35, %cst_22 {dimension_numbers = #tpu.dot_dimension_numbers<[2], [2], [1], [1], [0, 0, 0, 1, 1, 1], [0], [0]>} : vector<2x8x128xbf16>, vector<2x16x128xbf16>, vector<2x8x16xf32> -> vector<2x8x16xf32>
    "tpu.trace_stop"() : () -> ()
    %cst_23 = arith.constant dense<0xFF800000> : vector<2x8xf32>
    %47 = vector.multi_reduction <maximumf>, %46, %cst_23 [2] : vector<2x8x16xf32> to vector<2x8xf32>
    %48 = vector.shape_cast %47 : vector<2x8xf32> to vector<2x8x1xf32>
    %49 = vector.broadcast %48 : vector<2x8x1xf32> to vector<2x8x16xf32>
    %50 = arith.subf %46, %49 : vector<2x8x16xf32>
    %51 = math.exp %50 : vector<2x8x16xf32>
    %cst_24 = arith.constant dense<0.000000e+00> : vector<2x8xf32>
    %52 = vector.multi_reduction <add>, %51, %cst_24 [2] : vector<2x8x16xf32> to vector<2x8xf32>
    %53 = vector.shape_cast %52 : vector<2x8xf32> to vector<2x8x1xf32>
    %54 = tpu.reciprocal %53 {approx = true} : vector<2x8x1xf32> -> vector<2x8x1xf32>
    %55 = vector.broadcast %54 : vector<2x8x1xf32> to vector<2x8x16xf32>
    %56 = arith.mulf %51, %55 : vector<2x8x16xf32>
    %57 = arith.truncf %56 : vector<2x8x16xf32> to vector<2x8x16xbf16>
    "tpu.trace_start"() <{level = 10 : i32, message = "bqk,bkd->bqd"}> : () -> ()
    %cst_25 = arith.constant dense<0.000000e+00> : vector<2x8x128xf32>
    %58 = tpu.matmul %57, %37, %cst_25 {dimension_numbers = #tpu.dot_dimension_numbers<[2], [1], [1], [2], [0, 0, 0, 1, 1, 2], [0], [0]>} : vector<2x8x16xbf16>, vector<2x16x128xbf16>, vector<2x8x128xf32> -> vector<2x8x128xf32>
    "tpu.trace_stop"() : () -> ()
    %59 = arith.truncf %58 : vector<2x8x128xf32> to vector<2x8x128xbf16>
    %60 = vector.shape_cast %59 : vector<2x8x128xbf16> to vector<16x128xbf16>
    %c0_26 = arith.constant 0 : index
    %c0_27 = arith.constant 0 : index
    %61 = vector.load %arg8[%c0_26, %c0_27] : memref<128x128xbf16, #tpu.memory_space<vmem>>, vector<128x128xbf16>
    %cst_28 = arith.constant dense<0.000000e+00> : vector<16x128xf32>
    %62 = tpu.matmul %60, %61, %cst_28 {dimension_numbers = #tpu.dot_dimension_numbers<[1], [0], [0], [1], [0, 0, 1, 1], [], []>} : vector<16x128xbf16>, vector<128x128xbf16>, vector<16x128xf32> -> vector<16x128xf32>
    %63 = vector.shape_cast %62 : vector<16x128xf32> to vector<2x8x128xf32>
    %64 = arith.extf %39 : vector<8x128xbf16> to vector<8x128xf32>
    %65 = vector.shape_cast %64 : vector<8x128xf32> to vector<1x8x128xf32>
    %66 = vector.broadcast %65 : vector<1x8x128xf32> to vector<2x8x128xf32>
    %67 = arith.addf %63, %66 : vector<2x8x128xf32>
    %68 = arith.truncf %67 : vector<2x8x128xf32> to vector<2x8x128xbf16>
    %69 = vector.shape_cast %68 : vector<2x8x128xbf16> to vector<16x128xbf16>
    %c0_29 = arith.constant 0 : index
    %c0_30 = arith.constant 0 : index
    %70 = vector.load %arg9[%c0_29, %c0_30] : memref<128x128xbf16, #tpu.memory_space<vmem>>, vector<128x128xbf16>
    %cst_31 = arith.constant dense<0.000000e+00> : vector<16x128xf32>
    %71 = tpu.matmul %69, %70, %cst_31 {dimension_numbers = #tpu.dot_dimension_numbers<[1], [0], [0], [1], [0, 0, 1, 1], [], []>} : vector<16x128xbf16>, vector<128x128xbf16>, vector<16x128xf32> -> vector<16x128xf32>
    %c0_32 = arith.constant 0 : index
    %c0_33 = arith.constant 0 : index
    %72 = vector.load %arg10[%c0_32, %c0_33] : memref<1x128xf32, #tpu.memory_space<vmem>>, vector<1x128xf32>
    %73 = vector.broadcast %72 : vector<1x128xf32> to vector<16x128xf32>
    %74 = arith.addf %71, %73 : vector<16x128xf32>
    %75 = vector.shape_cast %74 : vector<16x128xf32> to vector<2x8x128xf32>
    %76 = arith.truncf %75 : vector<2x8x128xf32> to vector<2x8x128xbf16>
    %c0_34 = arith.constant 0 : index
    %c0_35 = arith.constant 0 : index
    %c0_36 = arith.constant 0 : index
    %77 = vector.load %arg11[%c0_34, %c0_35, %c0_36] : memref<2x8x128xbf16, #tpu.memory_space<vmem>>, vector<2x8x128xbf16>
    tpu.vector_store %arg11[%c0_34, %c0_35, %c0_36], %76 {strides = array<i32>} : memref<2x8x128xbf16, #tpu.memory_space<vmem>>, vector<2x8x128xbf16>,
    return
  }
  func.func @transform_0(%arg0: i32) -> (i32, i32, i32) {
    %c0_i32 = arith.constant 0 : i32
    %c0_i32_0 = arith.constant 0 : i32
    %c0_i32_1 = arith.constant 0 : i32
    return %arg0, %c0_i32, %c0_i32_0 : i32, i32, i32
  }
  func.func @transform_1(%arg0: i32) -> (i32, i32) {
    %c0_i32 = arith.constant 0 : i32
    %c0_i32_0 = arith.constant 0 : i32
    %c0_i32_1 = arith.constant 0 : i32
    return %c0_i32, %c0_i32_0 : i32, i32
  }
  func.func @transform_2(%arg0: i32) -> (i32, i32) {
    %c0_i32 = arith.constant 0 : i32
    %c0_i32_0 = arith.constant 0 : i32
    %c0_i32_1 = arith.constant 0 : i32
    return %c0_i32, %c0_i32_0 : i32, i32
  }
  func.func @transform_3(%arg0: i32) -> (i32, i32, i32) {
    %c0_i32 = arith.constant 0 : i32
    %c0_i32_0 = arith.constant 0 : i32
    %c0_i32_1 = arith.constant 0 : i32
    %c0_i32_2 = arith.constant 0 : i32
    return %c0_i32, %c0_i32_0, %c0_i32_1 : i32, i32, i32
  }
  func.func @transform_4(%arg0: i32) -> (i32, i32) {
    %c0_i32 = arith.constant 0 : i32
    %c0_i32_0 = arith.constant 0 : i32
    %c0_i32_1 = arith.constant 0 : i32
    return %c0_i32, %c0_i32_0 : i32, i32
  }
  func.func @transform_5(%arg0: i32) -> (i32, i32) {
    %c0_i32 = arith.constant 0 : i32
    %c0_i32_0 = arith.constant 0 : i32
    %c0_i32_1 = arith.constant 0 : i32
    return %c0_i32, %c0_i32_0 : i32, i32
  }
  func.func @transform_6(%arg0: i32) -> (i32, i32) {
    %c0_i32 = arith.constant 0 : i32
    %c0_i32_0 = arith.constant 0 : i32
    %c0_i32_1 = arith.constant 0 : i32
    return %c0_i32, %c0_i32_0 : i32, i32
  }
  func.func @transform_7(%arg0: i32) -> (i32, i32) {
    %c0_i32 = arith.constant 0 : i32
    %c0_i32_0 = arith.constant 0 : i32
    %c0_i32_1 = arith.constant 0 : i32
    return %c0_i32, %c0_i32_0 : i32, i32
  }
  func.func @transform_8(%arg0: i32) -> (i32, i32) {
    %c0_i32 = arith.constant 0 : i32
    %c0_i32_0 = arith.constant 0 : i32
    %c0_i32_1 = arith.constant 0 : i32
    return %c0_i32, %c0_i32_0 : i32, i32
  }
  func.func @transform_9(%arg0: i32) -> (i32, i32) {
    %c0_i32 = arith.constant 0 : i32
    %c0_i32_0 = arith.constant 0 : i32
    %c0_i32_1 = arith.constant 0 : i32
    return %c0_i32, %c0_i32_0 : i32, i32
  }
  func.func @transform_10(%arg0: i32) -> (i32, i32, i32) {
    %c0_i32 = arith.constant 0 : i32
    %c0_i32_0 = arith.constant 0 : i32
    %c0_i32_1 = arith.constant 0 : i32
    return %arg0, %c0_i32, %c0_i32_0 : i32, i32, i32
  }
}

module attributes {stable_mosaic.version = 11 : i64} {
  func.func @fused_vision_kernel(%arg0: i32, %arg1: memref<2x16x128xbf16, #tpu.memory_space<vmem>>, %arg2: memref<1x128xf32, #tpu.memory_space<vmem>>, %arg3: memref<1x128xf32, #tpu.memory_space<vmem>>, %arg4: memref<1x8x128xbf16, #tpu.memory_space<vmem>>, %arg5: memref<128x128xbf16, #tpu.memory_space<vmem>>, %arg6: memref<128x128xbf16, #tpu.memory_space<vmem>>, %arg7: memref<128x128xbf16, #tpu.memory_space<vmem>>, %arg8: memref<128x128xbf16, #tpu.memory_space<vmem>>, %arg9: memref<128x128xbf16, #tpu.memory_space<vmem>>, %arg10: memref<1x128xf32, #tpu.memory_space<vmem>>, %arg11: memref<2x8x128xbf16, #tpu.memory_space<vmem>>) attributes {dimension_semantics = [#tpu.dimension_semantics<parallel>], iteration_bounds = array<i64: 2>, scalar_prefetch = 0 : i64, scratch_operands = 0 : i64, tpu.core_type = #tpu.core_type<tc>, window_params = [{transform_indices = @transform_0, window_bounds = array<i64: 2, 16, 128>}, {pipeline_mode = #tpu.pipeline_mode<synchronous>, transform_indices = @transform_1, window_bounds = array<i64: 1, 128>}, {pipeline_mode = #tpu.pipeline_mode<synchronous>, transform_indices = @transform_2, window_bounds = array<i64: 1, 128>}, {pipeline_mode = #tpu.pipeline_mode<synchronous>, transform_indices = @transform_3, window_bounds = array<i64: 1, 8, 128>}, {pipeline_mode = #tpu.pipeline_mode<synchronous>, transform_indices = @transform_4, window_bounds = array<i64: 128, 128>}, {pipeline_mode = #tpu.pipeline_mode<synchronous>, transform_indices = @transform_5, window_bounds = array<i64: 128, 128>}, {pipeline_mode = #tpu.pipeline_mode<synchronous>, transform_indices = @transform_6, window_bounds = array<i64: 128, 128>}, {pipeline_mode = #tpu.pipeline_mode<synchronous>, transform_indices = @transform_7, window_bounds = array<i64: 128, 128>}, {pipeline_mode = #tpu.pipeline_mode<synchronous>, transform_indices = @transform_8, window_bounds = array<i64: 128, 128>}, {pipeline_mode = #tpu.pipeline_mode<synchronous>, transform_indices = @transform_9, window_bounds = array<i64: 1, 128>}, {transform_indices = @transform_10, window_bounds = array<i64: 2, 8, 128>}]} {
    %c0 = arith.constant 0 : index
    %c0_0 = arith.constant 0 : index
    %c0_1 = arith.constant 0 : index
    %0 = vector.load %arg1[%c0, %c0_0, %c0_1] : memref<2x16x128xbf16, #tpu.memory_space<vmem>>, vector<2x16x128xbf16>
    %1 = arith.extf %0 : vector<2x16x128xbf16> to vector<2x16x128xf32>
    %cst = arith.constant dense<0.000000e+00> : vector<2x16xf32>
    %2 = vector.multi_reduction <add>, %1, %cst [2] : vector<2x16x128xf32> to vector<2x16xf32>
    %3 = vector.shape_cast %2 : vector<2x16xf32> to vector<2x16x1xf32>
    %cst_2 = arith.constant 1.280000e+02 : f32
    %4 = vector.broadcast %cst_2 : f32 to vector<2x16x1xf32>
    %5 = arith.divf %3, %4 : vector<2x16x1xf32>
    %6 = vector.broadcast %5 : vector<2x16x1xf32> to vector<2x16x128xf32>
    %7 = arith.subf %1, %6 : vector<2x16x128xf32>
    %8 = arith.mulf %7, %7 : vector<2x16x128xf32>
    %cst_3 = arith.constant dense<0.000000e+00> : vector<2x16xf32>
    %9 = vector.multi_reduction <add>, %8, %cst_3 [2] : vector<2x16x128xf32> to vector<2x16xf32>
    %10 = vector.shape_cast %9 : vector<2x16xf32> to vector<2x16x1xf32>
    %cst_4 = arith.constant 1.280000e+02 : f32
    %11 = vector.broadcast %cst_4 : f32 to vector<2x16x1xf32>
    %12 = arith.divf %10, %11 : vector<2x16x1xf32>
    %13 = vector.broadcast %5 : vector<2x16x1xf32> to vector<2x16x128xf32>
    %14 = arith.subf %1, %13 : vector<2x16x128xf32>
    %cst_5 = arith.constant 9.99999974E-6 : f32
    %15 = vector.broadcast %cst_5 : f32 to vector<2x16x1xf32>
    %16 = arith.addf %12, %15 : vector<2x16x1xf32>
    %17 = math.rsqrt %16 : vector<2x16x1xf32>
    %18 = vector.broadcast %17 : vector<2x16x1xf32> to vector<2x16x128xf32>
    %19 = arith.mulf %14, %18 : vector<2x16x128xf32>
    %c0_6 = arith.constant 0 : index
    %c0_7 = arith.constant 0 : index
    %20 = vector.load %arg2[%c0_6, %c0_7] : memref<1x128xf32, #tpu.memory_space<vmem>>, vector<1x128xf32>
    %21 = vector.shape_cast %20 : vector<1x128xf32> to vector<1x1x128xf32>
    %22 = vector.broadcast %21 : vector<1x1x128xf32> to vector<2x16x128xf32>
    %23 = arith.mulf %19, %22 : vector<2x16x128xf32>
    %c0_8 = arith.constant 0 : index
    %c0_9 = arith.constant 0 : index
    %24 = vector.load %arg3[%c0_8, %c0_9] : memref<1x128xf32, #tpu.memory_space<vmem>>, vector<1x128xf32>
    %25 = vector.shape_cast %24 : vector<1x128xf32> to vector<1x1x128xf32>
    %26 = vector.broadcast %25 : vector<1x1x128xf32> to vector<2x16x128xf32>
    %27 = arith.addf %23, %26 : vector<2x16x128xf32>
    %28 = arith.truncf %27 : vector<2x16x128xf32> to vector<2x16x128xbf16>
    %29 = vector.shape_cast %28 : vector<2x16x128xbf16> to vector<32x128xbf16>
    %c0_10 = arith.constant 0 : index
    %c0_11 = arith.constant 0 : index
    %30 = vector.load %arg6[%c0_10, %c0_11] : memref<128x128xbf16, #tpu.memory_space<vmem>>, vector<128x128xbf16>
    %cst_12 = arith.constant dense<0.000000e+00> : vector<32x128xf32>
    %31 = tpu.matmul %29, %30, %cst_12 {dimension_numbers = #tpu.dot_dimension_numbers<[1], [0], [0], [1], [0, 0, 1, 1], [], []>} : vector<32x128xbf16>, vector<128x128xbf16>, vector<32x128xf32> -> vector<32x128xf32>
    %c0_13 = arith.constant 0 : index
    %c0_14 = arith.constant 0 : index
    %32 = vector.load %arg7[%c0_13, %c0_14] : memref<128x128xbf16, #tpu.memory_space<vmem>>, vector<128x128xbf16>
    %cst_15 = arith.constant dense<0.000000e+00> : vector<32x128xf32>
    %33 = tpu.matmul %29, %32, %cst_15 {dimension_numbers = #tpu.dot_dimension_numbers<[1], [0], [0], [1], [0, 0, 1, 1], [], []>} : vector<32x128xbf16>, vector<128x128xbf16>, vector<32x128xf32> -> vector<32x128xf32>
    %34 = arith.truncf %31 : vector<32x128xf32> to vector<32x128xbf16>
    %35 = vector.shape_cast %34 : vector<32x128xbf16> to vector<2x16x128xbf16>
    %36 = arith.truncf %33 : vector<32x128xf32> to vector<32x128xbf16>
    %37 = vector.shape_cast %36 : vector<32x128xbf16> to vector<2x16x128xbf16>
    %c0_16 = arith.constant 0 : index
    %c0_17 = arith.constant 0 : index
    %c0_18 = arith.constant 0 : index
    %38 = vector.load %arg4[%c0_16, %c0_17, %c0_18] : memref<1x8x128xbf16, #tpu.memory_space<vmem>>, vector<1x8x128xbf16>
    %39 = vector.shape_cast %38 : vector<1x8x128xbf16> to vector<8x128xbf16>
    %c0_19 = arith.constant 0 : index
    %c0_20 = arith.constant 0 : index
    %40 = vector.load %arg5[%c0_19, %c0_20] : memref<128x128xbf16, #tpu.memory_space<vmem>>, vector<128x128xbf16>
    %cst_21 = arith.constant dense<0.000000e+00> : vector<8x128xf32>
    %41 = tpu.matmul %39, %40, %cst_21 {dimension_numbers = #tpu.dot_dimension_numbers<[1], [0], [0], [1], [0, 0, 1, 1], [], []>} : vector<8x128xbf16>, vector<128x128xbf16>, vector<8x128xf32> -> vector<8x128xf32>
    %42 = arith.truncf %41 : vector<8x128xf32> to vector<8x128xbf16>
    %43 = vector.shape_cast %42 : vector<8x128xbf16> to vector<1x8x128xbf16>
    %44 = vector.shape_cast %43 : vector<1x8x128xbf16> to vector<1x8x128xbf16>
    %45 = vector.broadcast %44 : vector<1x8x128xbf16> to vector<2x8x128xbf16>
    "tpu.trace_start"() <{level = 10 : i32, message = "bqd,bkd->bqk"}> : () -> ()
    %cst_22 = arith.constant dense<0.000000e+00> : vector<2x8x16xf32>
    %46 = tpu.matmul %45, %35, %cst_22 {dimension_numbers = #tpu.dot_dimension_numbers<[2], [2], [1], [1], [0, 0, 0, 1, 1, 1], [0], [0]>} : vector<2x8x128xbf16>, vector<2x16x128xbf16>, vector<2x8x16xf32> -> vector<2x8x16xf32>
    "tpu.trace_stop"() : () -> ()
    %cst_23 = arith.constant dense<0xFF800000> : vector<2x8xf32>
    %47 = vector.multi_reduction <maximumf>, %46, %cst_23 [2] : vector<2x8x16xf32> to vector<2x8xf32>
    %48 = vector.shape_cast %47 : vector<2x8xf32> to vector<2x8x1xf32>
    %49 = vector.broadcast %48 : vector<2x8x1xf32> to vector<2x8x16xf32>
    %50 = arith.subf %46, %49 : vector<2x8x16xf32>
    %51 = math.exp %50 : vector<2x8x16xf32>
    %cst_24 = arith.constant dense<0.000000e+00> : vector<2x8xf32>
    %52 = vector.multi_reduction <add>, %51, %cst_24 [2] : vector<2x8x16xf32> to vector<2x8xf32>
    %53 = vector.shape_cast %52 : vector<2x8xf32> to vector<2x8x1xf32>
    %54 = tpu.reciprocal %53 {approx = true} : vector<2x8x1xf32> -> vector<2x8x1xf32>
    %55 = vector.broadcast %54 : vector<2x8x1xf32> to vector<2x8x16xf32>
    %56 = arith.mulf %51, %55 : vector<2x8x16xf32>
    %57 = arith.truncf %56 : vector<2x8x16xf32> to vector<2x8x16xbf16>
    "tpu.trace_start"() <{level = 10 : i32, message = "bqk,bkd->bqd"}> : () -> ()
    %cst_25 = arith.constant dense<0.000000e+00> : vector<2x8x128xf32>
    %58 = tpu.matmul %57, %37, %cst_25 {dimension_numbers = #tpu.dot_dimension_numbers<[2], [1], [1], [2], [0, 0, 0, 1, 1, 2], [0], [0]>} : vector<2x8x16xbf16>, vector<2x16x128xbf16>, vector<2x8x128xf32> -> vector<2x8x128xf32>
    "tpu.trace_stop"() : () -> ()
    %59 = arith.truncf %58 : vector<2x8x128xf32> to vector<2x8x128xbf16>
    %60 = vector.shape_cast %59 : vector<2x8x128xbf16> to vector<16x128xbf16>
    %c0_26 = arith.constant 0 : index
    %c0_27 = arith.constant 0 : index
    %61 = vector.load %arg8[%c0_26, %c0_27] : memref<128x128xbf16, #tpu.memory_space<vmem>>, vector<128x128xbf16>
    %cst_28 = arith.constant dense<0.000000e+00> : vector<16x128xf32>
    %62 = tpu.matmul %60, %61, %cst_28 {dimension_numbers = #tpu.dot_dimension_numbers<[1], [0], [0], [1], [0, 0, 1, 1], [], []>} : vector<16x128xbf16>, vector<128x128xbf16>, vector<16x128xf32> -> vector<16x128xf32>
    %63 = vector.shape_cast %62 : vector<16x128xf32> to vector<2x8x128xf32>
    %64 = arith.extf %39 : vector<8x128xbf16> to vector<8x128xf32>
    %65 = vector.shape_cast %64 : vector<8x128xf32> to vector<1x8x128xf32>
    %66 = vector.broadcast %65 : vector<1x8x128xf32> to vector<2x8x128xf32>
    %67 = arith.addf %63, %66 : vector<2x8x128xf32>
    %68 = arith.truncf %67 : vector<2x8x128xf32> to vector<2x8x128xbf16>
    %69 = vector.shape_cast %68 : vector<2x8x128xbf16> to vector<16x128xbf16>
    %c0_29 = arith.constant 0 : index
    %c0_30 = arith.constant 0 : index
    %70 = vector.load %arg9[%c0_29, %c0_30] : memref<128x128xbf16, #tpu.memory_space<vmem>>, vector<128x128xbf16>
    %cst_31 = arith.constant dense<0.000000e+00> : vector<16x128xf32>
    %71 = tpu.matmul %69, %70, %cst_31 {dimension_numbers = #tpu.dot_dimension_numbers<[1], [0], [0], [1], [0, 0, 1, 1], [], []>} : vector<16x128xbf16>, vector<128x128xbf16>, vector<16x128xf32> -> vector<16x128xf32>
    %c0_32 = arith.constant 0 : index
    %c0_33 = arith.constant 0 : index
    %72 = vector.load %arg10[%c0_32, %c0_33] : memref<1x128xf32, #tpu.memory_space<vmem>>, vector<1x128xf32>
    %73 = vector.broadcast %72 : vector<1x128xf32> to vector<16x128xf32>
    %74 = arith.addf %71, %73 : vector<16x128xf32>
    %75 = vector.shape_cast %74 : vector<16x128xf32> to vector<2x8x128xf32>
    %76 = arith.truncf %75 : vector<2x8x128xf32> to vector<2x8x128xbf16>
    %c0_34 = arith.constant 0 : index
    %c0_35 = arith.constant 0 : index
    %c0_36 = arith.constant 0 : index
    %77 = vector.load %arg11[%c0_34, %c0_35, %c0_36] : memref<2x8x128xbf16, #tpu.memory_space<vmem>>, vector<2x8x128xbf16>
    tpu.vector_store %arg11[%c0_34, %c0_35, %c0_36], %76 {strides = array<i32>} : memref<2x8x128xbf16, #tpu.memory_space<vmem>>, vector<2x8x128xbf16>,
    return
  }
  func.func @transform_0(%arg0: i32) -> (i32, i32, i32) {
    %c0_i32 = arith.constant 0 : i32
    %c0_i32_0 = arith.constant 0 : i32
    %c0_i32_1 = arith.constant 0 : i32
    return %arg0, %c0_i32, %c0_i32_0 : i32, i32, i32
  }
  func.func @transform_1(%arg0: i32) -> (i32, i32) {
    %c0_i32 = arith.constant 0 : i32
    %c0_i32_0 = arith.constant 0 : i32
    %c0_i32_1 = arith.constant 0 : i32
    return %c0_i32, %c0_i32_0 : i32, i32
  }
  func.func @transform_2(%arg0: i32) -> (i32, i32) {
    %c0_i32 = arith.constant 0 : i32
    %c0_i32_0 = arith.constant 0 : i32
    %c0_i32_1 = arith.constant 0 : i32
    return %c0_i32, %c0_i32_0 : i32, i32
  }
  func.func @transform_3(%arg0: i32) -> (i32, i32, i32) {
    %c0_i32 = arith.constant 0 : i32
    %c0_i32_0 = arith.constant 0 : i32
    %c0_i32_1 = arith.constant 0 : i32
    %c0_i32_2 = arith.constant 0 : i32
    return %c0_i32, %c0_i32_0, %c0_i32_1 : i32, i32, i32
  }
  func.func @transform_4(%arg0: i32) -> (i32, i32) {
    %c0_i32 = arith.constant 0 : i32
    %c0_i32_0 = arith.constant 0 : i32
    %c0_i32_1 = arith.constant 0 : i32
    return %c0_i32, %c0_i32_0 : i32, i32
  }
  func.func @transform_5(%arg0: i32) -> (i32, i32) {
    %c0_i32 = arith.constant 0 : i32
    %c0_i32_0 = arith.constant 0 : i32
    %c0_i32_1 = arith.constant 0 : i32
    return %c0_i32, %c0_i32_0 : i32, i32
  }
  func.func @transform_6(%arg0: i32) -> (i32, i32) {
    %c0_i32 = arith.constant 0 : i32
    %c0_i32_0 = arith.constant 0 : i32
    %c0_i32_1 = arith.constant 0 : i32
    return %c0_i32, %c0_i32_0 : i32, i32
  }
  func.func @transform_7(%arg0: i32) -> (i32, i32) {
    %c0_i32 = arith.constant 0 : i32
    %c0_i32_0 = arith.constant 0 : i32
    %c0_i32_1 = arith.constant 0 : i32
    return %c0_i32, %c0_i32_0 : i32, i32
  }
  func.func @transform_8(%arg0: i32) -> (i32, i32) {
    %c0_i32 = arith.constant 0 : i32
    %c0_i32_0 = arith.constant 0 : i32
    %c0_i32_1 = arith.constant 0 : i32
    return %c0_i32, %c0_i32_0 : i32, i32
  }
  func.func @transform_9(%arg0: i32) -> (i32, i32) {
    %c0_i32 = arith.constant 0 : i32
    %c0_i32_0 = arith.constant 0 : i32
    %c0_i32_1 = arith.constant 0 : i32
    return %c0_i32, %c0_i32_0 : i32, i32
  }
  func.func @transform_10(%arg0: i32) -> (i32, i32, i32) {
    %c0_i32 = arith.constant 0 : i32
    %c0_i32_0 = arith.constant 0 : i32
    %c0_i32_1 = arith.constant 0 : i32
    return %arg0, %c0_i32, %c0_i32_0 : i32, i32, i32
  }
}

</mosaic_0001>

<bundles_post_ra>
// kernel: tpu_custom_call.1
= control target key start
LH: loop header
LB: loop body
LE: loop exit
PB: predicated region body
PF: predicated region fallthrough
CT: control target
= control target key end

     0   :  { %s2923_s0 = inlined_call_operand.hbm [shape: bf16[4,16,128], index: 0, kind: input, shape index: {}]   ;;  %s2924_s1 = inlined_call_operand.hbm [shape: f32[1,128], index: 1, kind: input, shape index: {}]   ;;  %s2925_s2 = inlined_call_operand.hbm [shape: f32[1,128], index: 2, kind: input, shape index: {}]   ;;  %s2926_s3 = inlined_call_operand.hbm [shape: bf16[1,8,128], index: 3, kind: input, shape index: {}]   ;;  %s2927_s4 = inlined_call_operand.hbm [shape: bf16[128,128], index: 4, kind: input, shape index: {}]   ;;  %s2928_s5 = inlined_call_operand.hbm [shape: bf16[128,128], index: 5, kind: input, shape index: {}]   ;;  %s2929_s6 = inlined_call_operand.hbm [shape: bf16[128,128], index: 6, kind: input, shape index: {}]   ;;  %s2930_s7 = inlined_call_operand.hbm [shape: bf16[128,128], index: 7, kind: input, shape index: {}]   ;;  %s2931_s8 = inlined_call_operand.hbm [shape: bf16[128,128], index: 8, kind: input, shape index: {}]   ;;  %s2932_s9 = inlined_call_operand.hbm [shape: f32[1,128], index: 9, kind: input, shape index: {}]   ;;  %s2933_s10 = inlined_call_operand.hbm [shape: bf16[4,8,128], index: 10, kind: output, shape index: {}]  }
   0x1   :  { %2939 = sst [smem:[#allocation28_spill]] %s2924_s1 }
   0x2   :  { %2940 = sst [smem:[#allocation29_spill]] %s2926_s3 }
   0x3   :  { %2941 = sst [smem:[#allocation30_spill]] %s2933_s10 }
   0x4   :  { %15 = vsyncpa [#allocation3], 0 }
   0x5   :  { %17 = vsyncpa [#allocation3 + $0x1], 0 }
   0x6   :  { %18 = vsyncpa [#allocation6], 0 }
   0x7   :  { %19 = vsyncpa [#allocation9], 0 }
   0x8   :  { %20 = vsyncpa [#allocation12], 0 }
   0x9   :  { %21 = vsyncpa [#allocation15], 0 }
   0xa   :  { %22 = vsyncpa [#allocation18], 0 }
   0xb   :  { %23 = vsyncpa [#allocation4], 0 }
   0xc   :  { %25 = vsyncpa [#allocation4 + $0x1], 0  ;;  %s2441_s13 = smov 0   ;;  %s2443_s14 = smov 0  }
   0xd   :  { %s2445_s15 = smov 0   ;;  %s2447_s16 = smov 0  }
   0xe LB: > { %s2369_s17 = smov [#allocation5]   ;;  %s2462_s19 = sadd.s32 4294967295, %s2367_s16   ;;  %s2367_s16 = sphi %s2447_s16, %s2972_s16   ;;  %s2363_s15 = sphi %s2445_s15, %s2971_s15   ;;  %s2359_s14 = sphi %s2443_s14, %s2970_s14   ;;  %s2355_s13 = sphi %s2441_s13, %s2969_s13  }
   0xf   : > { %s290_s18 = sshll.u32 %s2369_s17, 4  ;;  %p1523_p0 = scmp.ge.s32.totalorder %s2367_s16, 1  ;;  %s2467_s18 = int_to_ptr.vmem [resolvable:$true] %s290_s18 }
  0x10   : > { %p2936_p1 = scmp.eq.s32.totalorder %s2462_s19, 0  ;;  %p277_p2 = scmp.lt.s32.totalorder %s2367_s16, 3 }
  0x11   : > { %s2370_s21 = smov [#allocation8]   ;;  %s2371_s24 = smov [#allocation11]  }
  0x12   : > { %p2469_p3 = pnand %p1523_p0, %p277_p2  ;;  %s312_s22 = sshll.u32 %s2370_s21, 4  ;;  %s2476_s22 = int_to_ptr.vmem [resolvable:$true] %s312_s22 }
  0x13   : > { %s335_s25 = sshll.u32 %s2371_s24, 4  ;;  %s2945_s1 = sld [smem:[#allocation28_spill]]  ;;  %s2484_s25 = int_to_ptr.vmem [resolvable:$true] %s335_s25 }
  0x14   : > { %s2942_s20 = scalar_select %p2469_p3, 1, 0 }
  0x15   : > { %p1840_p5 = pneg %p2469_p3 }
  0x16   : > { %2943 = sst [smem:[#allocation27_spill]] %s2942_s20 }
  0x17   : > { %p2480_p6 = pnand %p1840_p5, %p2936_p1 }
  0x19   : > { %s1999_s28 = scalar_lea.hbm %s2945_s1, 16  ;;  %p2494_p8 = pneg %p2480_p6 }
  0x1a   : > { %p2000_p7 = scmp.ne.s32.totalorder %s2945_s1, %s1999_s28  ;;  %p2006_p11 = scmp.lt.u32.totalorder %s1999_s28, %s2945_s1 }
  0x1c   : > { %p2002_p9 = pnand %p2494_p8, %p2000_p7 }
  0x1e   : > { %p2003_p10 = pneg %p2002_p9 }
  0x20   : > { %p2008_p12 = pnand %p2006_p11, %p2003_p10 }
  0x22   : > { %2011 = shalt.err (!%p2008_p12)
}
  0x23   : > { %s2012_s21 = scalar_lea.vmem %s2467_s18, 16  ;;  %s2019_s24 = scalar_lea.vmem %s2467_s18, 32 }
  0x24   : > { %p2013_p13 = scmp.ne.s32.totalorder %s2467_s18, %s2012_s21  ;;  %p2020_p5 = scmp.lt.s32.totalorder %s2467_s18, %s2467_s18 }
  0x25   : > { %p2021_p7 = scmp.lt.s32.totalorder %s2019_s24, %s2012_s21 }
  0x26   : > { %p2015_p0 = pnand %p2013_p13, %p2494_p8 }
  0x27   : > { %p2022_p9 = por %p2021_p7, %p2020_p5 }
  0x28   : > { %p2016_p2 = pneg %p2015_p0 }
  0x2a   : > { %p2023_p4 = pnand %p2022_p9, %p2016_p2 }
  0x2c   : > { %2026 = shalt.err (!%p2023_p4)
}
  0x2d   : > { %1843 = dma.hbm_to_vmem [thread:$0]  (!%p2480_p6), %s2945_s1, 16, %s2467_s18, [#allocation6]  }
  0x2e   : > { %s2947_s3 = sld [smem:[#allocation29_spill]] }
  0x34   : > { %s2027_s30 = scalar_lea.hbm %s2947_s3, 64 }
  0x35   : > { %p2028_p10 = scmp.ne.s32.totalorder %s2947_s3, %s2027_s30  ;;  %p2034_p4 = scmp.lt.u32.totalorder %s2027_s30, %s2947_s3 }
  0x37   : > { %p2030_p11 = pnand %p2028_p10, %p2494_p8 }
  0x39   : > { %p2031_p12 = pneg %p2030_p11 }
  0x3b   : > { %p2036_p13 = pnand %p2034_p4, %p2031_p12 }
  0x3d   : > { %2039 = shalt.err (!%p2036_p13)
}
  0x3e   : > { %s2040_s18 = scalar_lea.vmem %s2476_s22, 64  ;;  %p2048_p7 = scmp.lt.s32.totalorder %s2476_s22, %s2476_s22 }
  0x3f   : > { %p2041_p0 = scmp.ne.s32.totalorder %s2476_s22, %s2040_s18  ;;  %p2049_p9 = scmp.lt.s32.totalorder %s2040_s18, %s2040_s18 }
  0x41   : > { %p2043_p2 = pnand %p2041_p0, %p2494_p8  ;;  %p2050_p10 = por %p2049_p9, %p2048_p7 }
  0x43   : > { %p2044_p5 = pneg %p2043_p2 }
  0x45   : > { %p2051_p11 = pnand %p2050_p10, %p2044_p5 }
  0x47   : > { %2054 = shalt.err (!%p2051_p11)
}
  0x48   : > { %1849 = dma.hbm_to_vmem [thread:$0]  (!%p2480_p6), %s2947_s3, 64, %s2476_s22, [#allocation9]  }
  0x49   : > { %s2055_s30 = scalar_lea.hbm %s2928_s5, 1024 }
  0x4a   : > { %p2056_p12 = scmp.ne.s32.totalorder %s2928_s5, %s2055_s30  ;;  %p2062_p0 = scmp.lt.u32.totalorder %s2055_s30, %s2928_s5 }
  0x4c   : > { %p2058_p4 = pnand %p2056_p12, %p2494_p8 }
  0x4e   : > { %p2059_p13 = pneg %p2058_p4 }
  0x50   : > { %p2064_p2 = pnand %p2062_p0, %p2059_p13 }
  0x52   : > { %2067 = shalt.err (!%p2064_p2)
}
  0x53   : > { %s2068_s22 = scalar_lea.vmem %s2484_s25, 1024  ;;  %p2076_p10 = scmp.lt.s32.totalorder %s2484_s25, %s2484_s25 }
  0x54   : > { %p2069_p5 = scmp.ne.s32.totalorder %s2484_s25, %s2068_s22  ;;  %p2077_p11 = scmp.lt.s32.totalorder %s2068_s22, %s2068_s22 }
  0x56   : > { %p2071_p7 = pnand %p2069_p5, %p2494_p8  ;;  %p2078_p12 = por %p2077_p11, %p2076_p10 }
  0x58   : > { %p2072_p9 = pneg %p2071_p7 }
  0x5a   : > { %p2079_p4 = pnand %p2078_p12, %p2072_p9 }
  0x5c   : > { %2082 = shalt.err (!%p2079_p4)
}
  0x5d   : > { %s2372_s18 = smov 64   ;;  %s2373_s26 = smov 4  }
  0x5e   : > { %1855 = dma.hbm_to_vmem [thread:$0]  (!%p2480_p6), %s2928_s5, 1024, %s2484_s25, [#allocation12], %s2372_s18, %s2372_s18, %s2373_s26  }
  0x5f   : > { %s2374_s29 = smov [#allocation14]   ;;  %s2375_s12 = smov [#allocation7]  }
  0x60   : > { %s361_s30 = sshll.u32 %s2374_s29, 4  ;;  %s301_s17 = sshll.u32 %s2375_s12, 4  ;;  %s362_s30 = int_to_ptr.vmem [resolvable:$true] %s361_s30  ;;  %s302_s17 = int_to_ptr.vmem [resolvable:$true] %s301_s17 }
  0x61   : > { %s2083_s22 = scalar_lea.hbm %s2930_s7, 1024 }
  0x62   : > { %p2084_p13 = scmp.ne.s32.totalorder %s2930_s7, %s2083_s22  ;;  %p2090_p5 = scmp.lt.u32.totalorder %s2083_s22, %s2930_s7 }
  0x64   : > { %p2086_p0 = pnand %p2084_p13, %p2494_p8 }
  0x66   : > { %p2087_p2 = pneg %p2086_p0 }
  0x68   : > { %p2092_p7 = pnand %p2090_p5, %p2087_p2 }
  0x6a   : > { %2095 = shalt.err (!%p2092_p7)
}
  0x6b   : > { %s2096_s25 = scalar_lea.vmem %s362_s30, 1024  ;;  %p2104_p12 = scmp.lt.s32.totalorder %s362_s30, %s362_s30 }
  0x6c   : > { %p2097_p9 = scmp.ne.s32.totalorder %s362_s30, %s2096_s25  ;;  %p2105_p4 = scmp.lt.s32.totalorder %s2096_s25, %s2096_s25 }
  0x6e   : > { %p2099_p10 = pnand %p2097_p9, %p2494_p8  ;;  %p2106_p1 = por %p2105_p4, %p2104_p12 }
  0x70   : > { %p2100_p11 = pneg %p2099_p10 }
  0x72   : > { %p2107_p3 = pnand %p2106_p1, %p2100_p11 }
  0x74   : > { %2110 = shalt.err (!%p2107_p3)
}
  0x75   : > { %1861 = dma.hbm_to_vmem [thread:$0]  (!%p2480_p6), %s2930_s7, 1024, %s362_s30, [#allocation15], %s2372_s18, %s2372_s18, %s2373_s26  }
  0x76   : > { %s2111_s27 = scalar_lea.hbm %s2925_s2, 16 }
  0x77   : > { %p2112_p1 = scmp.ne.s32.totalorder %s2925_s2, %s2111_s27  ;;  %p2118_p0 = scmp.lt.u32.totalorder %s2111_s27, %s2925_s2 }
  0x79   : > { %p2114_p3 = pnand %p2112_p1, %p2494_p8 }
  0x7b   : > { %p2115_p13 = pneg %p2114_p3 }
  0x7d   : > { %p2120_p2 = pnand %p2118_p0, %p2115_p13 }
  0x7f   : > { %2123 = shalt.err (!%p2120_p2)
}
  0x80   : > { %s2124_s24 = scalar_lea.vmem %s302_s17, 16  ;;  %s2131_s30 = scalar_lea.vmem %s302_s17, 32 }
  0x81   : > { %p2125_p5 = scmp.ne.s32.totalorder %s302_s17, %s2124_s24  ;;  %p2132_p10 = scmp.lt.s32.totalorder %s302_s17, %s302_s17 }
  0x82   : > { %p2133_p11 = scmp.lt.s32.totalorder %s2131_s30, %s2124_s24 }
  0x83   : > { %p2127_p7 = pnand %p2125_p5, %p2494_p8 }
  0x84   : > { %p2134_p12 = por %p2133_p11, %p2132_p10 }
  0x85   : > { %p2128_p9 = pneg %p2127_p7 }
  0x87   : > { %p2135_p4 = pnand %p2134_p12, %p2128_p9 }
  0x89   : > { %2138 = shalt.err (!%p2135_p4)
}
  0x8a   : > { %1846 = dma.hbm_to_vmem [thread:$0]  (!%p2480_p6), %s2925_s2, 16, %s302_s17, [#allocation6]  }
  0x8b   : > { %s2376_s1 = smov [#allocation10]   ;;  %s2377_s10 = smov [#allocation13]  }
  0x8c   : > { %s322_s3 = sshll.u32 %s2376_s1, 4  ;;  %s348_s20 = sshll.u32 %s2377_s10, 4  ;;  %s323_s3 = int_to_ptr.vmem [resolvable:$true] %s322_s3  ;;  %s349_s20 = int_to_ptr.vmem [resolvable:$true] %s348_s20 }
  0x8d   : > { %s2139_s29 = scalar_lea.hbm %s2927_s4, 1024 }
  0x8e   : > { %p2140_p1 = scmp.ne.s32.totalorder %s2927_s4, %s2139_s29  ;;  %p2146_p0 = scmp.lt.u32.totalorder %s2139_s29, %s2927_s4 }
  0x90   : > { %p2142_p3 = pnand %p2140_p1, %p2494_p8 }
  0x92   : > { %p2143_p13 = pneg %p2142_p3 }
  0x94   : > { %p2148_p2 = pnand %p2146_p0, %p2143_p13 }
  0x96   : > { %2151 = shalt.err (!%p2148_p2)
}
  0x97   : > { %s2152_s17 = scalar_lea.vmem %s323_s3, 1024  ;;  %p2160_p10 = scmp.lt.s32.totalorder %s323_s3, %s323_s3 }
  0x98   : > { %p2153_p5 = scmp.ne.s32.totalorder %s323_s3, %s2152_s17  ;;  %p2161_p11 = scmp.lt.s32.totalorder %s2152_s17, %s2152_s17 }
  0x9a   : > { %p2155_p7 = pnand %p2153_p5, %p2494_p8  ;;  %p2162_p12 = por %p2161_p11, %p2160_p10 }
  0x9c   : > { %p2156_p9 = pneg %p2155_p7 }
  0x9e   : > { %p2163_p4 = pnand %p2162_p12, %p2156_p9 }
  0xa0   : > { %2166 = shalt.err (!%p2163_p4)
}
  0xa1   : > { %1852 = dma.hbm_to_vmem [thread:$0]  (!%p2480_p6), %s2927_s4, 1024, %s323_s3, [#allocation9], %s2372_s18, %s2372_s18, %s2373_s26  }
  0xa2   : > { %s2167_s27 = scalar_lea.hbm %s2929_s6, 1024 }
  0xa3   : > { %p2168_p1 = scmp.ne.s32.totalorder %s2929_s6, %s2167_s27  ;;  %p2174_p0 = scmp.lt.u32.totalorder %s2167_s27, %s2929_s6 }
  0xa5   : > { %p2170_p3 = pnand %p2168_p1, %p2494_p8 }
  0xa7   : > { %p2171_p13 = pneg %p2170_p3 }
  0xa9   : > { %p2176_p2 = pnand %p2174_p0, %p2171_p13 }
  0xab   : > { %2179 = shalt.err (!%p2176_p2)
}
  0xac   : > { %s2180_s24 = scalar_lea.vmem %s349_s20, 1024  ;;  %p2188_p10 = scmp.lt.s32.totalorder %s349_s20, %s349_s20 }
  0xad   : > { %p2181_p5 = scmp.ne.s32.totalorder %s349_s20, %s2180_s24  ;;  %p2189_p11 = scmp.lt.s32.totalorder %s2180_s24, %s2180_s24 }
  0xaf   : > { %p2183_p7 = pnand %p2181_p5, %p2494_p8  ;;  %p2190_p12 = por %p2189_p11, %p2188_p10 }
  0xb1   : > { %p2184_p9 = pneg %p2183_p7 }
  0xb3   : > { %p2191_p4 = pnand %p2190_p12, %p2184_p9 }
  0xb5   : > { %2194 = shalt.err (!%p2191_p4)
}
  0xb6   : > { %1858 = dma.hbm_to_vmem [thread:$0]  (!%p2480_p6), %s2929_s6, 1024, %s349_s20, [#allocation12], %s2372_s18, %s2372_s18, %s2373_s26  }
  0xb7   : > { %s2378_s17 = smov [#allocation16]   ;;  %s2379_s25 = smov [#allocation17]  }
  0xb8   : > { %s374_s22 = sshll.u32 %s2378_s17, 4  ;;  %s388_s1 = sshll.u32 %s2379_s25, 4  ;;  %s375_s22 = int_to_ptr.vmem [resolvable:$true] %s374_s22  ;;  %s389_s1 = int_to_ptr.vmem [resolvable:$true] %s388_s1 }
  0xb9   : > { %s2195_s28 = scalar_lea.hbm %s2931_s8, 1024 }
  0xba   : > { %p2196_p1 = scmp.ne.s32.totalorder %s2931_s8, %s2195_s28  ;;  %p2202_p0 = scmp.lt.u32.totalorder %s2195_s28, %s2931_s8 }
  0xbc   : > { %p2198_p3 = pnand %p2196_p1, %p2494_p8 }
  0xbe   : > { %p2199_p13 = pneg %p2198_p3 }
  0xc0   : > { %p2204_p2 = pnand %p2202_p0, %p2199_p13 }
  0xc2   : > { %2207 = shalt.err (!%p2204_p2)
}
  0xc3   : > { %s2208_s20 = scalar_lea.vmem %s375_s22, 1024  ;;  %p2216_p10 = scmp.lt.s32.totalorder %s375_s22, %s375_s22 }
  0xc4   : > { %p2209_p5 = scmp.ne.s32.totalorder %s375_s22, %s2208_s20  ;;  %p2217_p11 = scmp.lt.s32.totalorder %s2208_s20, %s2208_s20 }
  0xc6   : > { %p2211_p7 = pnand %p2209_p5, %p2494_p8  ;;  %p2218_p12 = por %p2217_p11, %p2216_p10 }
  0xc8   : > { %p2212_p9 = pneg %p2211_p7 }
  0xca   : > { %p2219_p4 = pnand %p2218_p12, %p2212_p9 }
  0xcc   : > { %2222 = shalt.err (!%p2219_p4)
}
  0xcd   : > { %1864 = dma.hbm_to_vmem [thread:$0]  (!%p2480_p6), %s2931_s8, 1024, %s375_s22, [#allocation15], %s2372_s18, %s2372_s18, %s2373_s26  }
  0xce   : > { %s2223_s10 = scalar_lea.hbm %s2932_s9, 16 }
  0xcf   : > { %p2224_p1 = scmp.ne.s32.totalorder %s2932_s9, %s2223_s10  ;;  %p2230_p0 = scmp.lt.u32.totalorder %s2223_s10, %s2932_s9 }
  0xd1   : > { %p2226_p3 = pnand %p2224_p1, %p2494_p8 }
  0xd3   : > { %p2227_p13 = pneg %p2226_p3 }
  0xd5   : > { %p2232_p2 = pnand %p2230_p0, %p2227_p13 }
  0xd7   : > { %2235 = shalt.err (!%p2232_p2)
}
  0xd8   : > { %s2236_s21 = scalar_lea.vmem %s389_s1, 16  ;;  %s2243_s22 = scalar_lea.vmem %s389_s1, 32 }
  0xd9   : > { %p2237_p5 = scmp.ne.s32.totalorder %s389_s1, %s2236_s21  ;;  %p2244_p10 = scmp.lt.s32.totalorder %s389_s1, %s389_s1 }
  0xda   : > { %p2245_p11 = scmp.lt.s32.totalorder %s2243_s22, %s2236_s21 }
  0xdb   : > { %p2239_p7 = pnand %p2237_p5, %p2494_p8 }
  0xdc   : > { %p2246_p12 = por %p2245_p11, %p2244_p10 }
  0xdd   : > { %p2240_p9 = pneg %p2239_p7 }
  0xdf   : > { %p2247_p4 = pnand %p2246_p12, %p2240_p9 }
  0xe1   : > { %2250 = shalt.err (!%p2247_p4)
}
  0xe2   : > { %1867 = dma.hbm_to_vmem [thread:$0]  (!%p2480_p6), %s2932_s9, 16, %s389_s1, [#allocation18]  }
  0xe3   : > { %s1522_s11 = sadd.s32 4294967294, %s2367_s16   ;;  %s2687_s23 = sadd.s32 1, %s2367_s16  }
  0xe4   : > { %s38_s3 = sadd.s32 1, %s2363_s15  ;;  %s35_s30 = ssub.s32 %s2367_s16, %s2687_s23 }
  0xe5   : > { %p45_p8 = scmp.ne.s32.totalorder %s2363_s15, %s2359_s14  ;;  %p36_p1 = scmp.eq.s32.totalorder %s35_s30, 0 }
  0xe6   : > { %p46_p3 = scmp.eq.s32.totalorder %s2367_s16, 0  ;;  %p51_p13 = scmp.ne.s32.totalorder %s2359_s14, %s2355_s13 }
  0xe7   : > { %p264_p0 = scmp.eq.s32.totalorder %s2462_s19, 1  ;;  %p2948_p5 = scmp.eq.s32.totalorder %s2462_s19, 0 }
  0xe8   : > { %s2699_s17 = scalar_select %p36_p1, %s2363_s15, %s38_s3  }
  0xe9   : > { %p47_p2 = por %p46_p3, %p45_p8  ;;  %p2703_p7 = por %p2948_p5, %p51_p13 }
  0xea   : > { %p2707_p6 = por %p264_p0, %p45_p8  ;;  %p270_p9 = scmp.eq.s32.totalorder %s1522_s11, 1 }
  0xeb   : > { %p1885_p10 = scmp.lt.s32.totalorder %s2367_s16, 2  ;;  %s399_s10 = sand.u32 1, %s2363_s15  }
  0xec   : > { %s2950_s1 = scalar_select %p2707_p6, 1, 0 }
  0xed   : > { %p2713_p11 = por %p270_p9, %p51_p13  ;;  %s1534_s28 = sshll.u32 %s399_s10, 4 }
  0xee   : > { %s1603_s29 = sshll.u32 %s2367_s16, 8  ;;  %s403_s24 = scalar_lea.vmem [#allocation2], %s1534_s28 }
  0xef   : > { %s2951_s27 = scalar_select %p2713_p11, 1, 0 }
  0xf0   : > { %s2721_s22 = scalar_lea.hbm %s2923_s0, %s1603_s29  ;;  %s411_s20 = sshll.u32 %s403_s24, 4  ;;  %s2727_s20 = int_to_ptr.vmem [resolvable:$true] %s411_s20 }
  0xf1   : > { %p2723_p12 = pnand %p1885_p10, %p47_p2  ;;  %s2729_s3 = scalar_lea.sflag [#allocation3], %s399_s10 }
  0xf2   : > { %s2251_s30 = scalar_lea.hbm %s2721_s22, 256  ;;  %s2256_s12 = scalar_lea.hbm %s2923_s0, 512 }
  0xf3   : > { %p2252_p4 = scmp.ne.s32.totalorder %s2721_s22, %s2251_s30  ;;  %p2253_p8 = pneg %p2723_p12 }
  0xf4   : > { %p2257_p13 = scmp.lt.u32.totalorder %s2721_s22, %s2923_s0  ;;  %p2258_p0 = scmp.lt.u32.totalorder %s2256_s12, %s2251_s30 }
  0xf5   : > { %p2254_p1 = pnand %p2253_p8, %p2252_p4  ;;  %p2260_p5 = scmp.lt.u32.totalorder %s2251_s30, %s2721_s22 }
  0xf6   : > { %p2259_p2 = por %p2258_p0, %p2257_p13 }
  0xf7   : > { %p2255_p3 = pneg %p2254_p1 }
  0xf8   : > { %p2261_p9 = por %p2260_p5, %p2259_p2 }
  0xfa   : > { %p2262_p10 = pnand %p2261_p9, %p2255_p3 }
  0xfc   : > { %2265 = shalt.err (!%p2262_p10)
}
  0xfd   : > { %s2266_s10 = scalar_lea.vmem %s2727_s20, 256  ;;  %s2380_s28 = smov [#allocation2]  }
  0xfe   : > { %p2267_p4 = scmp.ne.s32.totalorder %s2727_s20, %s2266_s10  ;;  %s2271_s29 = sshll.u32 %s2380_s28, 4  ;;  %s2272_s29 = int_to_ptr.vmem [resolvable:$false] %s2271_s29 }
  0xff   : > { %s2273_s21 = scalar_lea.vmem %s2272_s29, 512  ;;  %p2274_p6 = scmp.lt.s32.totalorder %s2727_s20, %s2272_s29 }
 0x100   : > { %p2269_p1 = pnand %p2267_p4, %p2253_p8  ;;  %p2275_p13 = scmp.lt.s32.totalorder %s2273_s21, %s2266_s10 }
 0x102   : > { %p2270_p11 = pneg %p2269_p1  ;;  %p2276_p0 = por %p2275_p13, %p2274_p6 }
 0x104   : > { %p2277_p2 = pnand %p2276_p0, %p2270_p11 }
 0x106   : > { %2280 = shalt.err (!%p2277_p2)
}
 0x107   : > { %1871 = dma.hbm_to_vmem [thread:$0]  (!%p2723_p12), %s2721_s22, 256, %s2727_s20, %s2729_s3, %s2372_s18, %s2372_s18, %s2373_s26  }
 0x108   : > { %s2953_s30 = sld [smem:[#allocation27_spill]] }
 0x10e   : > { %p2954_p8 = scmp.ne.s32.totalorder %s2953_s30, 0 }
 0x10f   : > { %s2763_s12 = sand.u32 (!%p2954_p8), 1, %s2359_s14  }
 0x110   : > { %423 = sbr.rel (%p2954_p8) target bundleno = 2067 (0x813), region = 60  ;;  %s1539_s24 = sshll.u32 (!%p2954_p8), %s2763_s12, 4 }
 0x111   : > { %s426_s10 = scalar_lea.sflag (!%p2954_p8), [#allocation3], %s2763_s12  ;;  %s429_s28 = scalar_lea.vmem (!%p2954_p8), [#allocation2], %s1539_s24 }
 0x117   : > { %2326 = dma.done.wait (%p2703_p7), %s426_s10, 256  }
 0x118   : > { %2328 = vsyncadd (%p2703_p7), %s426_s10, 4294967040  ;;  %p2955_p6 = scmp.eq.s32.totalorder %s2462_s19, 0 }
 0x11a   : > { %2330 = dma.done.wait (%p2955_p6), [#allocation6], 32   ;;  %p2956_p11 = pmov %p2955_p6 }
 0x11b   : > { %p2957_p12 = pmov %p2955_p6 }
 0x11c   : > { %2332 = vsyncadd (%p2956_p11), [#allocation6], 4294967264 }
 0x11d   : > { %2334 = dma.done.wait (%p2957_p12), [#allocation9], 1088   ;;  %p2958_p3 = pmov %p2955_p6 }
 0x11f   : > { %2336 = vsyncadd (%p2958_p3), [#allocation9], 4294966208  ;;  %p2959_p5 = pmov %p2958_p3 }
 0x120   : > { %p2960_p9 = pmov %p2958_p3 }
 0x121   : > { %2338 = dma.done.wait (%p2959_p5), [#allocation12], 2048  }
 0x122   : > { %2340 = vsyncadd (%p2960_p9), [#allocation12], 4294965248  ;;  %p2961_p7 = pmov %p2958_p3 }
 0x123   : > { %p2962_p10 = pmov %p2958_p3 }
 0x124   : > { %2342 = dma.done.wait (%p2961_p7), [#allocation15], 2048  }
 0x125   : > { %2344 = vsyncadd (%p2962_p10), [#allocation15], 4294965248  ;;  %p2963_p4 = pmov %p2958_p3 }
 0x126   : > { %p2964_p1 = pmov %p2958_p3 }
 0x127   : > { %2346 = dma.done.wait (%p2963_p4), [#allocation18], 16  }
 0x128   : > { %2348 = vsyncadd (%p2964_p1), [#allocation18], 4294967280  ;;  %v1608_v0 = vld [vmem:[%s429_s28] sm:$0xff]   ;;  %v1620_v1 = vld [vmem:[%s429_s28 + $0x8] sm:$0xff]   ;;  %v2381_v38 = vmov 0.0   ;;  %vm2382_vm0 = vmmov 0  }
 0x129   : > { %v1609_v2 = vunpack.c.l.bf16 %v1608_v0  ;;  %v1613_v3 = vunpack.c.l.bf16 %v1620_v1  ;;  %v1610_v4 = vunpack.c.h.bf16 %v1608_v0  ;;  %v1614_v5 = vunpack.c.h.bf16 %v1620_v1  ;;  %v1943_v6 = vld [vmem:[#allocation11] sm:$0xff]   ;;  %v1945_v24 = vld [vmem:[#allocation11 + $0x8] sm:$0xff]   ;;  %v1947_v26 = vld [vmem:[#allocation11 + $0x10] sm:$0xff]   ;;  %s1549_s18 = sshll.u32 %s2763_s12, 3  ;;  %s1606_s22 = sshll.u32 %s2462_s19, 7 }
 0x12a   : > { %v1944_v7 = vld [vmem:[#allocation13] sm:$0xff]   ;;  %1676 = vmatprep.subr.bf16.mxu0 %v1943_v6  ;;  %v1946_v25 = vld [vmem:[#allocation13 + $0x8] sm:$0xff]   ;;  %v1948_v27 = vld [vmem:[#allocation13 + $0x10] sm:$0xff]   ;;  %vm998_vm1 = vcmask 130048   ;;  %s501_s26 = scalar_lea.vmem [#allocation19], %s1549_s18  ;;  %s2965_s3 = sld [smem:[#allocation30_spill]] }
 0x12b   : > { %513 = vadd.xlane.f32.xlu0 %v1609_v2  ;;  %517 = vadd.xlane.f32.xlu1 %v1613_v3  ;;  %v1949_v28 = vld [vmem:[#allocation11 + $0x18] sm:$0xff]   ;;  %v1951_v30 = vld [vmem:[#allocation11 + $0x20] sm:$0xff]   ;;  %v1953_v32 = vld [vmem:[#allocation11 + $0x28] sm:$0xff]   ;;  %s1363_s25 = sshll.u32 %s501_s26, 4  ;;  %s1350_s21 = scalar_lea.sflag [#allocation4], %s2763_s12  ;;  %s2874_s25 = int_to_ptr.vmem [resolvable:$true] %s1363_s25 }
 0x12c   : > { %1696 = vmatprep.subr.bf16.mxu1 %v1944_v7  ;;  %1677 = vmatpush3.bf16.msra.mxu0 %v1943_v6  ;;  %v1950_v29 = vld [vmem:[#allocation13 + $0x18] sm:$0xff]   ;;  %v1952_v31 = vld [vmem:[#allocation13 + $0x20] sm:$0xff]   ;;  %v1954_v33 = vld [vmem:[#allocation13 + $0x28] sm:$0xff]   ;;  %s2281_s30 = scalar_lea.vmem %s2874_s25, 128  ;;  %p2966_p0 = scmp.ne.s32.totalorder %s2950_s1, 0 }
 0x12d   : > { %1697 = vmatpush3.bf16.msra.mxu1 %v1944_v7  ;;  %1678 = vmatprep.subr.bf16.mxu0 %v1945_v24  ;;  %v1955_v34 = vld [vmem:[#allocation11 + $0x30] sm:$0xff]   ;;  %v1957_v36 = vld [vmem:[#allocation11 + $0x38] sm:$0xff]   ;;  %v1959_v6 = vld [vmem:[#allocation10] sm:$0xff]   ;;  %p2282_p13 = scmp.ne.s32.totalorder %s2874_s25, %s2281_s30  ;;  %s2383_s19 = smov [#allocation19]  }
 0x12e   : > { %1698 = vmatprep.subr.bf16.mxu1 %v1946_v25  ;;  %v1956_v35 = vld [vmem:[#allocation13 + $0x30] sm:$0xff]   ;;  %v1958_v37 = vld [vmem:[#allocation13 + $0x38] sm:$0xff]   ;;  %s2285_s24 = sshll.u32 %s2383_s19, 4  ;;  %s2286_s24 = int_to_ptr.vmem [resolvable:$false] %s2285_s24 }
 0x12f   : > { %515 = vadd.xlane.f32.xlu0 %v1610_v4  ;;  %519 = vadd.xlane.f32.xlu1 %v1614_v5  ;;  %v1550_v53 = vld [vmem:[#allocation5] ss:$0 sm:$0xff]  ;;  %v1551_v58 = vld [vmem:[#allocation7] ss:$0 sm:$0xff]  ;;  %p2283_p2 = pnand %p2282_p13, %p2966_p0  ;;  %s2287_s10 = scalar_lea.vmem %s2286_s24, 256 }
 0x130   : > { %1679 = vmatpush3.bf16.msra.mxu0 %v1945_v24  ;;  %s2879_s29 = scalar_lea.hbm %s2965_s3, %s1606_s22  ;;  %p2288_p6 = scmp.lt.s32.totalorder %s2874_s25, %s2286_s24 }
 0x131   : > { %1699 = vmatpush3.bf16.msra.mxu1 %v1946_v25  ;;  %1680 = vmatprep.subr.bf16.mxu0 %v1947_v26  ;;  %p2284_p8 = pneg %p2283_p2  ;;  %p2289_p11 = scmp.lt.s32.totalorder %s2287_s10, %s2281_s30 }
 0x132   : > { %1700 = vmatprep.subr.bf16.mxu1 %v1948_v27 }
 0x133   : > { %p2290_p12 = por %p2289_p11, %p2288_p6 }
 0x134   : > { %1681 = vmatpush3.bf16.msra.mxu0 %v1947_v26 }
 0x135   : > { %1701 = vmatpush3.bf16.msra.mxu1 %v1948_v27  ;;  %1682 = vmatprep.subr.bf16.mxu0 %v1949_v28  ;;  %p2291_p3 = pnand %p2290_p12, %p2284_p8 }
 0x136   : > { %1702 = vmatprep.subr.bf16.mxu1 %v1950_v29 }
 0x138   : > { %1683 = vmatpush3.bf16.msra.mxu0 %v1949_v28 }
 0x139   : > { %1703 = vmatpush3.bf16.msra.mxu1 %v1950_v29  ;;  %1684 = vmatprep.subr.bf16.mxu0 %v1951_v30 }
 0x13a   : > { %1704 = vmatprep.subr.bf16.mxu1 %v1952_v31 }
 0x13c   : > { %1685 = vmatpush3.bf16.msra.mxu0 %v1951_v30 }
 0x13d   : > { %1705 = vmatpush3.bf16.msra.mxu1 %v1952_v31  ;;  %1686 = vmatprep.subr.bf16.mxu0 %v1953_v32 }
 0x13e   : > { %1706 = vmatprep.subr.bf16.mxu1 %v1954_v33 }
 0x140   : > { %1687 = vmatpush3.bf16.msra.mxu0 %v1953_v32 }
 0x141   : > { %1707 = vmatpush3.bf16.msra.mxu1 %v1954_v33  ;;  %1688 = vmatprep.subr.bf16.mxu0 %v1955_v34 }
 0x142   : > { %1708 = vmatprep.subr.bf16.mxu1 %v1956_v35 }
 0x144   : > { %1689 = vmatpush3.bf16.msra.mxu0 %v1955_v34 }
 0x145   : > { %1709 = vmatpush3.bf16.msra.mxu1 %v1956_v35  ;;  %1690 = vmatprep.subr.bf16.mxu0 %v1957_v36 }
 0x146   : > { %1710 = vmatprep.subr.bf16.mxu1 %v1958_v37 }
 0x148   : > { %1691 = vmatpush3.bf16.msra.mxu0 %v1957_v36 }
 0x149   : > { %1711 = vmatpush3.bf16.msra.mxu1 %v1958_v37  ;;  %1716 = vmatprep.subr.bf16.mxu0 %v2381_v38 }
 0x14a   : > { %1736 = vmatprep.subr.bf16.mxu1 %v2381_v38 }
 0x1b8   : > { %v514_v8 = vpop.xlane.xlu0 %513  ;;  %v518_v9 = vpop.xlane.xlu1 %517 }
 0x1b9   : > { %v522_v10 = vmul.f32 0.0078125, %v514_v8  ;;  %v524_v11 = vmul.f32 0.0078125, %v518_v9  ;;  %v1960_v8 = vld [vmem:[#allocation10 + $0x8] sm:$0xff]   ;;  %v1961_v9 = vld [vmem:[#allocation10 + $0x10] sm:$0xff]  }
 0x1bb   : > { %v2791_v12 = vsub.f32 %v1609_v2, %v522_v10  ;;  %v2793_v13 = vsub.f32 %v1613_v3, %v524_v11  ;;  %v1962_v10 = vld [vmem:[#allocation10 + $0x18] sm:$0xff]   ;;  %v1963_v11 = vld [vmem:[#allocation10 + $0x20] sm:$0xff]  }
 0x1bc   : > { %v516_v14 = vpop.xlane.xlu0 %515  ;;  %v520_v15 = vpop.xlane.xlu1 %519 }
 0x1bd   : > { %v523_v16 = vmul.f32 0.0078125, %v516_v14  ;;  %v530_v17 = vmul.f32 %v2791_v12, %v2791_v12  ;;  %v525_v18 = vmul.f32 0.0078125, %v520_v15  ;;  %v532_v21 = vmul.f32 %v2793_v13, %v2793_v13  ;;  %v1966_v14 = vld [vmem:[#allocation10 + $0x38] sm:$0xff]  }
 0x1be   : > { %v2824_v15 = vld [vmem:[#allocation8] sm:$0xf] }
 0x1bf   : > { %v2797_v19 = vsub.f32 %v1610_v4, %v523_v16  ;;  %534 = vadd.xlane.f32.xlu0 %v530_v17  ;;  %v2799_v20 = vsub.f32 %v1614_v5, %v525_v18 }
 0x1c1   : > { %v531_v22 = vmul.f32 %v2797_v19, %v2797_v19  ;;  %v533_v23 = vmul.f32 %v2799_v20, %v2799_v20 }
 0x1c3   : > { %538 = vadd.xlane.f32.xlu0 %v532_v21  ;;  %536 = vadd.xlane.f32.xlu1 %v531_v22 }
 0x1c7   : > { %540 = vadd.xlane.f32.xlu1 %v533_v23 }
 0x24c   : > { %v535_v39 = vpop.xlane.xlu0 %534 }
 0x24d   : > { %v542_v40 = vmul.f32 0.0078125, %v535_v39 }
 0x24f   : > { %v546_v41 = vadd.f32 1e-05, %v542_v40 }
 0x250   : > { %v537_v42 = vpop.xlane.xlu1 %536  ;;  %v539_v43 = vpop.xlane.xlu0 %538 }
 0x251   : > { %1983 = vrsqrt.f32 %v546_v41  ;;  %v543_v44 = vmul.f32 0.0078125, %v537_v42  ;;  %v544_v45 = vmul.f32 0.0078125, %v539_v43 }
 0x253   : > { %v547_v46 = vadd.f32 1e-05, %v543_v44  ;;  %v548_v47 = vadd.f32 1e-05, %v544_v45 }
 0x254   : > { %v541_v48 = vpop.xlane.xlu1 %540 }
 0x255   : > { %1985 = vrsqrt.f32 %v547_v46  ;;  %v545_v49 = vmul.f32 0.0078125, %v541_v48 }
 0x256   : > { %1987 = vrsqrt.f32 %v548_v47 }
 0x257   : > { %v549_v50 = vadd.f32 1e-05, %v545_v49 }
 0x259   : > { %1989 = vrsqrt.f32 %v549_v50 }
 0x25b   : > { %v1984_v51 = vpop.eup %1983 }
 0x25c   : > { %v554_v52 = vmul.f32 %v1984_v51, %v2791_v12  ;;  %v1964_v12 = vld [vmem:[#allocation10 + $0x28] sm:$0xff]  }
 0x25e   : > { %v565_v57 = vmul.f32 %v1550_v53, %v554_v52 }
 0x25f   : > { %v1986_v54 = vpop.eup %1985 }
 0x260   : > { %v1988_v55 = vpop.eup %1987  ;;  %v555_v56 = vmul.f32 %v1986_v54, %v2797_v19  ;;  %v576_v62 = vadd.f32 %v1551_v58, %v565_v57  ;;  %v1967_v54 = vld [vmem:[#allocation14] sm:$0xff]   ;;  %v1970_v57 = vld [vmem:[#allocation14 + $0x18] sm:$0xff]  }
 0x261   : > { %v556_v59 = vmul.f32 %v1988_v55, %v2793_v13  ;;  %v1965_v13 = vld [vmem:[#allocation10 + $0x30] sm:$0xff]   ;;  %v1968_v55 = vld [vmem:[#allocation14 + $0x8] sm:$0xff]  }
 0x262   : > { %v566_v60 = vmul.f32 %v1550_v53, %v555_v56  ;;  %v1969_v56 = vld [vmem:[#allocation14 + $0x10] sm:$0xff]  }
 0x263   : > { %v1990_v61 = vpop.eup %1989  ;;  %v567_v1 = vmul.f32 %v1550_v53, %v556_v59 }
 0x264   : > { %v577_v63 = vadd.f32 %v1551_v58, %v566_v60  ;;  %v557_v0 = vmul.f32 %v1990_v61, %v2799_v20 }
 0x265   : > { %v578_v4 = vadd.f32 %v1551_v58, %v567_v1 }
 0x266   : > { %v580_v2 = vpack.c.bf16 %v577_v63, %v576_v62  ;;  %v568_v3 = vmul.f32 %v1550_v53, %v557_v0 }
 0x268   : > { %1692 = vmatprep.mubr.bf16.mxu0 %v580_v2  ;;  %1712 = vmatprep.mubr.bf16.mxu1 %v580_v2  ;;  %v579_v5 = vadd.f32 %v1551_v58, %v568_v3  ;;  %v1971_v58 = vld [vmem:[#allocation14 + $0x20] sm:$0xff]   ;;  %v1972_v3 = vld [vmem:[#allocation14 + $0x28] sm:$0xff]  }
 0x26a   : > { %v581_v7 = vpack.c.bf16 %v579_v5, %v578_v4  ;;  %v1973_v4 = vld [vmem:[#allocation14 + $0x30] sm:$0xff]   ;;  %v1974_v5 = vld [vmem:[#allocation14 + $0x38] sm:$0xff]  }
 0x26c   : > { %1693 = vmatmul.mubr.bf16.vlgmr.msra.gmra.mrb[0].mxu0 %v581_v7  ;;  %1713 = vmatmul.mubr.bf16.vlgmr.msra.gmra.mrb[0].mxu1 %v581_v7  ;;  %v1976_v7 = vld [vmem:[#allocation16 + $0x8] sm:$0xff]  }
 0x26d   : > { %1717 = vmatpush3.bf16.msra.mxu0 %v1959_v6  ;;  %1732 = vmatprep.mubr.msk.bf16.mxu0 %vm2382_vm0, %v2381_v38  ;;  %v1975_v6 = vld [vmem:[#allocation16] sm:$0xff]  }
 0x26e   : > { %1718 = vmatprep.subr.bf16.mxu0 %v2381_v38  ;;  %1738 = vmatprep.mubr.msk.bf16.mxu1 %vm2382_vm0, %v2381_v38 }
 0x271   : > { %1719 = vmatpush3.bf16.msra.mxu0 %v1960_v8  ;;  %v1977_v8 = vld [vmem:[#allocation16 + $0x10] sm:$0xff]  }
 0x272   : > { %1720 = vmatprep.subr.bf16.mxu0 %v2381_v38 }
 0x275   : > { %1721 = vmatpush3.bf16.msra.mxu0 %v1961_v9  ;;  %v1978_v9 = vld [vmem:[#allocation16 + $0x18] sm:$0xff]  }
 0x276   : > { %1722 = vmatprep.subr.bf16.mxu0 %v2381_v38 }
 0x279   : > { %1723 = vmatpush3.bf16.msra.mxu0 %v1962_v10  ;;  %v1979_v10 = vld [vmem:[#allocation16 + $0x20] sm:$0xff]  }
 0x27a   : > { %1724 = vmatprep.subr.bf16.mxu0 %v2381_v38 }
 0x27d   : > { %1725 = vmatpush3.bf16.msra.mxu0 %v1963_v11  ;;  %v1980_v11 = vld [vmem:[#allocation16 + $0x28] sm:$0xff]  }
 0x27e   : > { %1726 = vmatprep.subr.bf16.mxu0 %v2381_v38 }
 0x281   : > { %1727 = vmatpush3.bf16.msra.mxu0 %v1964_v12 }
 0x282   : > { %1728 = vmatprep.subr.bf16.mxu0 %v2381_v38 }
 0x285   : > { %1729 = vmatpush3.bf16.msra.mxu0 %v1965_v13 }
 0x286   : > { %1730 = vmatprep.subr.bf16.mxu0 %v2381_v38 }
 0x289   : > { %1731 = vmatpush3.bf16.msra.mxu0 %v1966_v14 }
 0x28a   : > { %1760 = vmatprep.subr.bf16.mxu0 %v2381_v38 }
 0x28c   : > { %1733 = vmatmul.mubr.bf16.vlgmr.msra.gmra.mrb[4].mxu0 %v2824_v15 }
 0x28d   : > { %1776 = vmatprep.mubr.msk.bf16.mxu0 %vm2382_vm0, %v2381_v38  ;;  %1761 = vmatpush3.bf16.msra.mxu0 %v1967_v54 }
 0x28e   : > { %1762 = vmatprep.subr.bf16.mxu0 %v2381_v38 }
 0x291   : > { %1763 = vmatpush3.bf16.msra.mxu0 %v1968_v55 }
 0x292   : > { %1764 = vmatprep.subr.bf16.mxu0 %v2381_v38 }
 0x295   : > { %1765 = vmatpush3.bf16.msra.mxu0 %v1969_v56 }
 0x296   : > { %1766 = vmatprep.subr.bf16.mxu0 %v2381_v38 }
 0x299   : > { %1767 = vmatpush3.bf16.msra.mxu0 %v1970_v57 }
 0x29a   : > { %1768 = vmatprep.subr.bf16.mxu0 %v2381_v38 }
 0x29d   : > { %1769 = vmatpush3.bf16.msra.mxu0 %v1971_v58 }
 0x29e   : > { %1770 = vmatprep.subr.bf16.mxu0 %v2381_v38 }
 0x2a1   : > { %1771 = vmatpush3.bf16.msra.mxu0 %v1972_v3 }
 0x2a2   : > { %1772 = vmatprep.subr.bf16.mxu0 %v2381_v38 }
 0x2a5   : > { %1773 = vmatpush3.bf16.msra.mxu0 %v1973_v4 }
 0x2a6   : > { %1774 = vmatprep.subr.bf16.mxu0 %v2381_v38 }
 0x2a9   : > { %1775 = vmatpush3.bf16.msra.mxu0 %v1974_v5 }
 0x33f   : > { %v1694_v16 = vpop.f32.mrb[0].mxu0  ;;  %v2830_v17 = vpop.f32.mrb[0].mxu1 }
 0x340   : > { %v680_v18 = vpop.f32.mrb[1].mxu0  ;;  %v793_v19 = vpop.f32.mrb[1].mxu1 }
 0x341   : > { %v1695_v20 = vpop.f32.mrb[2].mxu0  ;;  %v2832_v21 = vpop.f32.mrb[2].mxu1 }
 0x342   : > { %v809_v22 = vpack.c.bf16 %v1695_v20, %v1694_v16  ;;  %v811_v23 = vpack.c.bf16 %v2832_v21, %v2830_v17  ;;  %v683_v24 = vpop.f32.mrb[3].mxu0  ;;  %v796_v25 = vpop.f32.mrb[3].mxu1 }
 0x343   : > { %v808_v26 = vpack.c.bf16 %v683_v24, %v680_v18  ;;  %v810_v27 = vpack.c.bf16 %v796_v25, %v793_v19  ;;  %v1222_v24 = vunpack.c.l.bf16 %v2824_v15 }
 0x345   : > { %1737 = vmatpush3.bf16.xpose.msra.mxu1 %v808_v26 }
 0x346   : > { %1742 = vmatprep.subr.bf16.mxu1 %v2381_v38 }
 0x35f   : > { %v911_v28 = vpop.f32.mrb[4].mxu0 }
 0x360   : > { %v917_v29 = vpack.c.bf16 %v911_v28, %v911_v28  ;;  %v1734_v30 = vpop.f32.mrb[5].mxu0 }
 0x361   : > { %v914_v31 = vpop.f32.mrb[6].mxu0 }
 0x362   : > { %v1735_v32 = vpop.f32.mrb[7].mxu0  ;;  %1739 = vmatmul.mubr.bf16.vlgmr.msra.gmra.mrb[4].mxu1 %v917_v29 }
 0x363   : > { %1743 = vmatpush3.bf16.xpose.msra.mxu1 %v809_v22  ;;  %1744 = vmatprep.mubr.msk.bf16.mxu1 %vm2382_vm0, %v2381_v38  ;;  %v1981_v22 = vld [vmem:[#allocation16 + $0x30] sm:$0xff]   ;;  %v1587_v32 = vld [vmem:[#allocation17] ss:$0 sm:$0xff] }
 0x364   : > { %1748 = vmatprep.subr.bf16.mxu1 %v2381_v38 }
 0x36a   : > { %1745 = vmatmul.mubr.bf16.vlgmr.msra.gmra.mrb[8].mxu1 %v917_v29 }
 0x36b   : > { %1749 = vmatpush3.bf16.msra.mxu1 %v810_v27  ;;  %1750 = vmatprep.mubr.msk.bf16.mxu1 %vm2382_vm0, %v2381_v38 }
 0x36c   : > { %1754 = vmatprep.subr.bf16.mxu1 %v2381_v38 }
 0x435   : > { %v952_v33 = vpop.f32.mrb[4].mxu1 }
 0x436   : > { %v1740_v34 = vpop.f32.mrb[5].mxu1  ;;  %v999_v35 = vsel %vm998_vm1, %v952_v33, -inf }
 0x437   : > { %1000 = vmax.xlane.f32.xlu0 %v999_v35  ;;  %v955_v36 = vpop.f32.mrb[6].mxu1 }
 0x438   : > { %v1741_v37 = vpop.f32.mrb[7].mxu1 }
 0x43d   : > { %v992_v39 = vpop.f32.mrb[8].mxu1 }
 0x43e   : > { %v1746_v40 = vpop.f32.mrb[9].mxu1  ;;  %v1002_v41 = vsel %vm998_vm1, %v992_v39, -inf }
 0x43f   : > { %1003 = vmax.xlane.f32.xlu1 %v1002_v41  ;;  %v995_v42 = vpop.f32.mrb[10].mxu1 }
 0x440   : > { %v1747_v43 = vpop.f32.mrb[11].mxu1 }
 0x4c4   : > { %v1001_v44 = vpop.xlane.xlu0 %1000 }
 0x4c5   : > { %v1005_v45 = vsub.f32 %v952_v33, %v1001_v44 }
 0x4c7   : > { %v1007_v46 = vmul.f32 1.442695, %v1005_v45 }
 0x4c9   : > { %1991 = vpow2.f32 %v1007_v46 }
 0x4cc   : > { %v1004_v47 = vpop.xlane.xlu1 %1003 }
 0x4cd   : > { %v1006_v48 = vsub.f32 %v992_v39, %v1004_v47 }
 0x4cf   : > { %v1009_v49 = vmul.f32 1.442695, %v1006_v48 }
 0x4d1   : > { %1993 = vpow2.f32 %v1009_v49 }
 0x4d3   : > { %v1992_v50 = vpop.eup %1991 }
 0x4d4   : > { %v1011_v51 = vsel %vm998_vm1, %v1992_v50, 0.0 }
 0x4d5   : > { %1012 = vadd.xlane.f32.xlu0 %v1011_v51 }
 0x4db   : > { %v1994_v52 = vpop.eup %1993 }
 0x4dc   : > { %v1014_v53 = vsel %vm998_vm1, %v1994_v52, 0.0 }
 0x4dd   : > { %1015 = vadd.xlane.f32.xlu1 %v1014_v53 }
 0x562   : > { %v1013_v59 = vpop.xlane.xlu0 %1012 }
 0x563   : > { %1995 = vrcp.f32 %v1013_v59 }
 0x56a   : > { %v1016_v60 = vpop.xlane.xlu1 %1015 }
 0x56b   : > { %1997 = vrcp.f32 %v1016_v60 }
 0x56d   : > { %v1996_v61 = vpop.eup %1995 }
 0x56e   : > { %v1019_v62 = vmul.f32 %v1996_v61, %v1992_v50 }
 0x570   : > { %v1021_v63 = vpack.c.bf16 %v1019_v62, %v1019_v62 }
 0x572   : > { %1751 = vmatmul.mubr.msk.bf16.vlgmr.msra.gmra.mrb[12].mxu1 %vm998_vm1, %v1021_v63 }
 0x573   : > { %1755 = vmatpush3.bf16.msra.mxu1 %v811_v23  ;;  %1756 = vmatprep.mubr.msk.bf16.mxu1 %vm2382_vm0, %v2381_v38  ;;  %v1982_v23 = vld [vmem:[#allocation16 + $0x38] sm:$0xff]  }
 0x574   : > { %1780 = vmatprep.subr.bf16.mxu1 %v2381_v38 }
 0x575   : > { %v1998_v0 = vpop.eup %1997 }
 0x576   : > { %v1020_v1 = vmul.f32 %v1998_v0, %v1994_v52 }
 0x578   : > { %v1022_v2 = vpack.c.bf16 %v1020_v1, %v1020_v1 }
 0x57a   : > { %1757 = vmatmul.mubr.msk.bf16.vlgmr.msra.gmra.mrb[16].mxu1 %vm998_vm1, %v1022_v2 }
 0x57b   : > { %1796 = vmatprep.mubr.msk.bf16.mxu1 %vm2382_vm0, %v2381_v38  ;;  %1781 = vmatpush3.bf16.msra.mxu1 %v1975_v6 }
 0x57c   : > { %1782 = vmatprep.subr.bf16.mxu1 %v2381_v38 }
 0x57f   : > { %1783 = vmatpush3.bf16.msra.mxu1 %v1976_v7 }
 0x580   : > { %1784 = vmatprep.subr.bf16.mxu1 %v2381_v38 }
 0x583   : > { %1785 = vmatpush3.bf16.msra.mxu1 %v1977_v8 }
 0x584   : > { %1786 = vmatprep.subr.bf16.mxu1 %v2381_v38 }
 0x587   : > { %1787 = vmatpush3.bf16.msra.mxu1 %v1978_v9 }
 0x588   : > { %1788 = vmatprep.subr.bf16.mxu1 %v2381_v38 }
 0x58b   : > { %1789 = vmatpush3.bf16.msra.mxu1 %v1979_v10 }
 0x58c   : > { %1790 = vmatprep.subr.bf16.mxu1 %v2381_v38 }
 0x58f   : > { %1791 = vmatpush3.bf16.msra.mxu1 %v1980_v11 }
 0x590   : > { %1792 = vmatprep.subr.bf16.mxu1 %v2381_v38 }
 0x593   : > { %1793 = vmatpush3.bf16.msra.mxu1 %v1981_v22 }
 0x594   : > { %1794 = vmatprep.subr.bf16.mxu1 %v2381_v38 }
 0x597   : > { %1795 = vmatpush3.bf16.msra.mxu1 %v1982_v23 }
 0x645   : > { %v1060_v12 = vpop.f32.mrb[12].mxu1 }
 0x646   : > { %v1752_v13 = vpop.f32.mrb[13].mxu1 }
 0x647   : > { %v1063_v14 = vpop.f32.mrb[14].mxu1 }
 0x648   : > { %v1753_v16 = vpop.f32.mrb[15].mxu1 }
 0x64d   : > { %v1103_v17 = vpop.f32.mrb[16].mxu1 }
 0x64e   : > { %v1604_v18 = vpack.c.bf16 %v1103_v17, %v1060_v12  ;;  %v1758_v19 = vpop.f32.mrb[17].mxu1 }
 0x64f   : > { %v1106_v20 = vpop.f32.mrb[18].mxu1 }
 0x650   : > { %v1759_v21 = vpop.f32.mrb[19].mxu1  ;;  %1777 = vmatmul.mubr.bf16.vlgmr.msra.gmra.mrb[8].mxu0 %v1604_v18 }
 0x723   : > { %v1215_v25 = vpop.f32.mrb[8].mxu0 }
 0x724   : > { %v1778_v26 = vpop.f32.mrb[9].mxu0  ;;  %v1223_v28 = vadd.f32 %v1222_v24, %v1215_v25 }
 0x725   : > { %v1218_v27 = vpop.f32.mrb[10].mxu0 }
 0x726   : > { %v1224_v29 = vadd.f32 %v1222_v24, %v1218_v27  ;;  %v1779_v30 = vpop.f32.mrb[11].mxu0 }
 0x728   : > { %v1605_v31 = vpack.c.bf16 %v1224_v29, %v1223_v28 }
 0x72a   : > { %1797 = vmatmul.mubr.bf16.vlgmr.msra.gmra.mrb[20].mxu1 %v1605_v31 }
 0x7fd   : > { %v1338_v33 = vpop.f32.mrb[20].mxu1 }
 0x7fe   : > { %v1798_v34 = vpop.f32.mrb[21].mxu1  ;;  %v1339_v35 = vadd.f32 %v1587_v32, %v1338_v33 }
 0x7ff   : > { %v1341_v38 = vpop.f32.mrb[22].mxu1 }
 0x800   : > { %v1342_v15 = vadd.f32 %v1587_v32, %v1341_v38  ;;  %v1799_v36 = vpop.f32.mrb[23].mxu1 }
 0x802   : > { %v1618_v37 = vpack.c.bf16 %v1342_v15, %v1339_v35 }
 0x804   : > { %1619 = vst [vmem:[%s501_s26] sm:$0xff] %v1618_v37  }
 0x805   : > { %2294 = shalt.err (!%p2291_p3)
}
 0x806   : > { %s2295_s28 = scalar_lea.hbm %s2879_s29, 128  ;;  %s2299_s22 = scalar_lea.hbm %s2965_s3, 256 }
 0x807   : > { %p2296_p5 = scmp.ne.s32.totalorder %s2879_s29, %s2295_s28  ;;  %p2300_p10 = scmp.lt.u32.totalorder %s2879_s29, %s2965_s3 }
 0x808   : > { %p2301_p4 = scmp.lt.u32.totalorder %s2299_s22, %s2295_s28  ;;  %p2303_p13 = scmp.lt.u32.totalorder %s2295_s28, %s2879_s29 }
 0x809   : > { %p2297_p9 = pnand %p2296_p5, %p2966_p0 }
 0x80a   : > { %p2302_p1 = por %p2301_p4, %p2300_p10 }
 0x80b   : > { %p2298_p7 = pneg %p2297_p9 }
 0x80c   : > { %p2304_p2 = por %p2303_p13, %p2302_p1 }
 0x80e   : > { %p2305_p8 = pnand %p2304_p2, %p2298_p7 }
 0x810   : > { %2308 = shalt.err (!%p2305_p8)
}
 0x811   : > { %s2384_s30 = smov 64   ;;  %s2385_s19 = smov 4  }
 0x812   : > { %1838 = dma.vmem_to_hbm [thread:$0]  (%p2966_p0), %s2874_s25, 128, %s2879_s29, %s1350_s21, %s2384_s30, %s2384_s30, %s2385_s19  }
 0x813 PF: > { %s1378_s24 = sand.u32 1, %s2355_s13   ;;  %p2967_p6 = scmp.ne.s32.totalorder %s2951_s27, 0 }
 0x814   : > { %p2968_p11 = scmp.ge.s32.totalorder %s2367_s16, 2  ;;  %s1379_s10 = scalar_lea.sflag [#allocation4], %s1378_s24 }
 0x816   : > { %p1873_p12 = pnand %p2968_p11, %p2967_p6 }
 0x818   : > { %2350 = dma.done.wait (!%p1873_p12), %s1379_s10, 128  }
 0x819   : > { %2352 = vsyncadd (!%p1873_p12), %s1379_s10, 4294967168  ;;  %p28_p3 = scmp.ge.s32.totalorder %s2687_s23, 4   ;;  %s2969_s13 = smov %s2359_s14 }
 0x81a   : > { %s2970_s14 = smov %s2363_s15  ;;  %s2971_s15 = smov %s2699_s17 }
 0x81b   : > { %s2972_s16 = smov %s2687_s23  ;;  %30 = sbr.rel (!%p28_p3) target bundleno = 14 (0xe), region = 141 }
 0x822   :  { %1384 = vsyncpa [#allocation3], 1 }
 0x823   :  { %1386 = vsyncpa [#allocation3 + $0x1], 1 }
 0x824   :  { %1387 = vsyncpa [#allocation6], 1 }
 0x825   :  { %1388 = vsyncpa [#allocation9], 1 }
 0x826   :  { %1389 = vsyncpa [#allocation12], 1 }
 0x827   :  { %1390 = vsyncpa [#allocation15], 1 }
 0x828   :  { %1391 = vsyncpa [#allocation18], 1 }
 0x829   :  { %1392 = vsyncpa [#allocation4], 1 }
 0x82a   :  { %1394 = vsyncpa [#allocation4 + $0x1], 1 }

// kernel: tpu_custom_call.1
= control target key start
LH: loop header
LB: loop body
LE: loop exit
PB: predicated region body
PF: predicated region fallthrough
CT: control target
= control target key end

     0   :  { %s2923_s0 = inlined_call_operand.hbm [shape: bf16[4,16,128], index: 0, kind: input, shape index: {}]   ;;  %s2924_s1 = inlined_call_operand.hbm [shape: f32[1,128], index: 1, kind: input, shape index: {}]   ;;  %s2925_s2 = inlined_call_operand.hbm [shape: f32[1,128], index: 2, kind: input, shape index: {}]   ;;  %s2926_s3 = inlined_call_operand.hbm [shape: bf16[1,8,128], index: 3, kind: input, shape index: {}]   ;;  %s2927_s4 = inlined_call_operand.hbm [shape: bf16[128,128], index: 4, kind: input, shape index: {}]   ;;  %s2928_s5 = inlined_call_operand.hbm [shape: bf16[128,128], index: 5, kind: input, shape index: {}]   ;;  %s2929_s6 = inlined_call_operand.hbm [shape: bf16[128,128], index: 6, kind: input, shape index: {}]   ;;  %s2930_s7 = inlined_call_operand.hbm [shape: bf16[128,128], index: 7, kind: input, shape index: {}]   ;;  %s2931_s8 = inlined_call_operand.hbm [shape: bf16[128,128], index: 8, kind: input, shape index: {}]   ;;  %s2932_s9 = inlined_call_operand.hbm [shape: f32[1,128], index: 9, kind: input, shape index: {}]   ;;  %s2933_s10 = inlined_call_operand.hbm [shape: bf16[4,8,128], index: 10, kind: output, shape index: {}]  }
   0x1   :  { %2939 = sst [smem:[#allocation28_spill]] %s2924_s1 }
   0x2   :  { %2940 = sst [smem:[#allocation29_spill]] %s2926_s3 }
   0x3   :  { %2941 = sst [smem:[#allocation30_spill]] %s2933_s10 }
   0x4   :  { %15 = vsyncpa [#allocation3], 0 }
   0x5   :  { %17 = vsyncpa [#allocation3 + $0x1], 0 }
   0x6   :  { %18 = vsyncpa [#allocation6], 0 }
   0x7   :  { %19 = vsyncpa [#allocation9], 0 }
   0x8   :  { %20 = vsyncpa [#allocation12], 0 }
   0x9   :  { %21 = vsyncpa [#allocation15], 0 }
   0xa   :  { %22 = vsyncpa [#allocation18], 0 }
   0xb   :  { %23 = vsyncpa [#allocation4], 0 }
   0xc   :  { %25 = vsyncpa [#allocation4 + $0x1], 0  ;;  %s2441_s13 = smov 0   ;;  %s2443_s14 = smov 0  }
   0xd   :  { %s2445_s15 = smov 0   ;;  %s2447_s16 = smov 0  }
   0xe LB: > { %s2369_s17 = smov [#allocation5]   ;;  %s2462_s19 = sadd.s32 4294967295, %s2367_s16   ;;  %s2367_s16 = sphi %s2447_s16, %s2972_s16   ;;  %s2363_s15 = sphi %s2445_s15, %s2971_s15   ;;  %s2359_s14 = sphi %s2443_s14, %s2970_s14   ;;  %s2355_s13 = sphi %s2441_s13, %s2969_s13  }
   0xf   : > { %s290_s18 = sshll.u32 %s2369_s17, 4  ;;  %p1523_p0 = scmp.ge.s32.totalorder %s2367_s16, 1  ;;  %s2467_s18 = int_to_ptr.vmem [resolvable:$true] %s290_s18 }
  0x10   : > { %p2936_p1 = scmp.eq.s32.totalorder %s2462_s19, 0  ;;  %p277_p2 = scmp.lt.s32.totalorder %s2367_s16, 3 }
  0x11   : > { %s2370_s21 = smov [#allocation8]   ;;  %s2371_s24 = smov [#allocation11]  }
  0x12   : > { %p2469_p3 = pnand %p1523_p0, %p277_p2  ;;  %s312_s22 = sshll.u32 %s2370_s21, 4  ;;  %s2476_s22 = int_to_ptr.vmem [resolvable:$true] %s312_s22 }
  0x13   : > { %s335_s25 = sshll.u32 %s2371_s24, 4  ;;  %s2945_s1 = sld [smem:[#allocation28_spill]]  ;;  %s2484_s25 = int_to_ptr.vmem [resolvable:$true] %s335_s25 }
  0x14   : > { %s2942_s20 = scalar_select %p2469_p3, 1, 0 }
  0x15   : > { %p1840_p5 = pneg %p2469_p3 }
  0x16   : > { %2943 = sst [smem:[#allocation27_spill]] %s2942_s20 }
  0x17   : > { %p2480_p6 = pnand %p1840_p5, %p2936_p1 }
  0x19   : > { %s1999_s28 = scalar_lea.hbm %s2945_s1, 16  ;;  %p2494_p8 = pneg %p2480_p6 }
  0x1a   : > { %p2000_p7 = scmp.ne.s32.totalorder %s2945_s1, %s1999_s28  ;;  %p2006_p11 = scmp.lt.u32.totalorder %s1999_s28, %s2945_s1 }
  0x1c   : > { %p2002_p9 = pnand %p2494_p8, %p2000_p7 }
  0x1e   : > { %p2003_p10 = pneg %p2002_p9 }
  0x20   : > { %p2008_p12 = pnand %p2006_p11, %p2003_p10 }
  0x22   : > { %2011 = shalt.err (!%p2008_p12)
}
  0x23   : > { %s2012_s21 = scalar_lea.vmem %s2467_s18, 16  ;;  %s2019_s24 = scalar_lea.vmem %s2467_s18, 32 }
  0x24   : > { %p2013_p13 = scmp.ne.s32.totalorder %s2467_s18, %s2012_s21  ;;  %p2020_p5 = scmp.lt.s32.totalorder %s2467_s18, %s2467_s18 }
  0x25   : > { %p2021_p7 = scmp.lt.s32.totalorder %s2019_s24, %s2012_s21 }
  0x26   : > { %p2015_p0 = pnand %p2013_p13, %p2494_p8 }
  0x27   : > { %p2022_p9 = por %p2021_p7, %p2020_p5 }
  0x28   : > { %p2016_p2 = pneg %p2015_p0 }
  0x2a   : > { %p2023_p4 = pnand %p2022_p9, %p2016_p2 }
  0x2c   : > { %2026 = shalt.err (!%p2023_p4)
}
  0x2d   : > { %1843 = dma.hbm_to_vmem [thread:$0]  (!%p2480_p6), %s2945_s1, 16, %s2467_s18, [#allocation6]  }
  0x2e   : > { %s2947_s3 = sld [smem:[#allocation29_spill]] }
  0x34   : > { %s2027_s30 = scalar_lea.hbm %s2947_s3, 64 }
  0x35   : > { %p2028_p10 = scmp.ne.s32.totalorder %s2947_s3, %s2027_s30  ;;  %p2034_p4 = scmp.lt.u32.totalorder %s2027_s30, %s2947_s3 }
  0x37   : > { %p2030_p11 = pnand %p2028_p10, %p2494_p8 }
  0x39   : > { %p2031_p12 = pneg %p2030_p11 }
  0x3b   : > { %p2036_p13 = pnand %p2034_p4, %p2031_p12 }
  0x3d   : > { %2039 = shalt.err (!%p2036_p13)
}
  0x3e   : > { %s2040_s18 = scalar_lea.vmem %s2476_s22, 64  ;;  %p2048_p7 = scmp.lt.s32.totalorder %s2476_s22, %s2476_s22 }
  0x3f   : > { %p2041_p0 = scmp.ne.s32.totalorder %s2476_s22, %s2040_s18  ;;  %p2049_p9 = scmp.lt.s32.totalorder %s2040_s18, %s2040_s18 }
  0x41   : > { %p2043_p2 = pnand %p2041_p0, %p2494_p8  ;;  %p2050_p10 = por %p2049_p9, %p2048_p7 }
  0x43   : > { %p2044_p5 = pneg %p2043_p2 }
  0x45   : > { %p2051_p11 = pnand %p2050_p10, %p2044_p5 }
  0x47   : > { %2054 = shalt.err (!%p2051_p11)
}
  0x48   : > { %1849 = dma.hbm_to_vmem [thread:$0]  (!%p2480_p6), %s2947_s3, 64, %s2476_s22, [#allocation9]  }
  0x49   : > { %s2055_s30 = scalar_lea.hbm %s2928_s5, 1024 }
  0x4a   : > { %p2056_p12 = scmp.ne.s32.totalorder %s2928_s5, %s2055_s30  ;;  %p2062_p0 = scmp.lt.u32.totalorder %s2055_s30, %s2928_s5 }
  0x4c   : > { %p2058_p4 = pnand %p2056_p12, %p2494_p8 }
  0x4e   : > { %p2059_p13 = pneg %p2058_p4 }
  0x50   : > { %p2064_p2 = pnand %p2062_p0, %p2059_p13 }
  0x52   : > { %2067 = shalt.err (!%p2064_p2)
}
  0x53   : > { %s2068_s22 = scalar_lea.vmem %s2484_s25, 1024  ;;  %p2076_p10 = scmp.lt.s32.totalorder %s2484_s25, %s2484_s25 }
  0x54   : > { %p2069_p5 = scmp.ne.s32.totalorder %s2484_s25, %s2068_s22  ;;  %p2077_p11 = scmp.lt.s32.totalorder %s2068_s22, %s2068_s22 }
  0x56   : > { %p2071_p7 = pnand %p2069_p5, %p2494_p8  ;;  %p2078_p12 = por %p2077_p11, %p2076_p10 }
  0x58   : > { %p2072_p9 = pneg %p2071_p7 }
  0x5a   : > { %p2079_p4 = pnand %p2078_p12, %p2072_p9 }
  0x5c   : > { %2082 = shalt.err (!%p2079_p4)
}
  0x5d   : > { %s2372_s18 = smov 64   ;;  %s2373_s26 = smov 4  }
  0x5e   : > { %1855 = dma.hbm_to_vmem [thread:$0]  (!%p2480_p6), %s2928_s5, 1024, %s2484_s25, [#allocation12], %s2372_s18, %s2372_s18, %s2373_s26  }
  0x5f   : > { %s2374_s29 = smov [#allocation14]   ;;  %s2375_s12 = smov [#allocation7]  }
  0x60   : > { %s361_s30 = sshll.u32 %s2374_s29, 4  ;;  %s301_s17 = sshll.u32 %s2375_s12, 4  ;;  %s362_s30 = int_to_ptr.vmem [resolvable:$true] %s361_s30  ;;  %s302_s17 = int_to_ptr.vmem [resolvable:$true] %s301_s17 }
  0x61   : > { %s2083_s22 = scalar_lea.hbm %s2930_s7, 1024 }
  0x62   : > { %p2084_p13 = scmp.ne.s32.totalorder %s2930_s7, %s2083_s22  ;;  %p2090_p5 = scmp.lt.u32.totalorder %s2083_s22, %s2930_s7 }
  0x64   : > { %p2086_p0 = pnand %p2084_p13, %p2494_p8 }
  0x66   : > { %p2087_p2 = pneg %p2086_p0 }
  0x68   : > { %p2092_p7 = pnand %p2090_p5, %p2087_p2 }
  0x6a   : > { %2095 = shalt.err (!%p2092_p7)
}
  0x6b   : > { %s2096_s25 = scalar_lea.vmem %s362_s30, 1024  ;;  %p2104_p12 = scmp.lt.s32.totalorder %s362_s30, %s362_s30 }
  0x6c   : > { %p2097_p9 = scmp.ne.s32.totalorder %s362_s30, %s2096_s25  ;;  %p2105_p4 = scmp.lt.s32.totalorder %s2096_s25, %s2096_s25 }
  0x6e   : > { %p2099_p10 = pnand %p2097_p9, %p2494_p8  ;;  %p2106_p1 = por %p2105_p4, %p2104_p12 }
  0x70   : > { %p2100_p11 = pneg %p2099_p10 }
  0x72   : > { %p2107_p3 = pnand %p2106_p1, %p2100_p11 }
  0x74   : > { %2110 = shalt.err (!%p2107_p3)
}
  0x75   : > { %1861 = dma.hbm_to_vmem [thread:$0]  (!%p2480_p6), %s2930_s7, 1024, %s362_s30, [#allocation15], %s2372_s18, %s2372_s18, %s2373_s26  }
  0x76   : > { %s2111_s27 = scalar_lea.hbm %s2925_s2, 16 }
  0x77   : > { %p2112_p1 = scmp.ne.s32.totalorder %s2925_s2, %s2111_s27  ;;  %p2118_p0 = scmp.lt.u32.totalorder %s2111_s27, %s2925_s2 }
  0x79   : > { %p2114_p3 = pnand %p2112_p1, %p2494_p8 }
  0x7b   : > { %p2115_p13 = pneg %p2114_p3 }
  0x7d   : > { %p2120_p2 = pnand %p2118_p0, %p2115_p13 }
  0x7f   : > { %2123 = shalt.err (!%p2120_p2)
}
  0x80   : > { %s2124_s24 = scalar_lea.vmem %s302_s17, 16  ;;  %s2131_s30 = scalar_lea.vmem %s302_s17, 32 }
  0x81   : > { %p2125_p5 = scmp.ne.s32.totalorder %s302_s17, %s2124_s24  ;;  %p2132_p10 = scmp.lt.s32.totalorder %s302_s17, %s302_s17 }
  0x82   : > { %p2133_p11 = scmp.lt.s32.totalorder %s2131_s30, %s2124_s24 }
  0x83   : > { %p2127_p7 = pnand %p2125_p5, %p2494_p8 }
  0x84   : > { %p2134_p12 = por %p2133_p11, %p2132_p10 }
  0x85   : > { %p2128_p9 = pneg %p2127_p7 }
  0x87   : > { %p2135_p4 = pnand %p2134_p12, %p2128_p9 }
  0x89   : > { %2138 = shalt.err (!%p2135_p4)
}
  0x8a   : > { %1846 = dma.hbm_to_vmem [thread:$0]  (!%p2480_p6), %s2925_s2, 16, %s302_s17, [#allocation6]  }
  0x8b   : > { %s2376_s1 = smov [#allocation10]   ;;  %s2377_s10 = smov [#allocation13]  }
  0x8c   : > { %s322_s3 = sshll.u32 %s2376_s1, 4  ;;  %s348_s20 = sshll.u32 %s2377_s10, 4  ;;  %s323_s3 = int_to_ptr.vmem [resolvable:$true] %s322_s3  ;;  %s349_s20 = int_to_ptr.vmem [resolvable:$true] %s348_s20 }
  0x8d   : > { %s2139_s29 = scalar_lea.hbm %s2927_s4, 1024 }
  0x8e   : > { %p2140_p1 = scmp.ne.s32.totalorder %s2927_s4, %s2139_s29  ;;  %p2146_p0 = scmp.lt.u32.totalorder %s2139_s29, %s2927_s4 }
  0x90   : > { %p2142_p3 = pnand %p2140_p1, %p2494_p8 }
  0x92   : > { %p2143_p13 = pneg %p2142_p3 }
  0x94   : > { %p2148_p2 = pnand %p2146_p0, %p2143_p13 }
  0x96   : > { %2151 = shalt.err (!%p2148_p2)
}
  0x97   : > { %s2152_s17 = scalar_lea.vmem %s323_s3, 1024  ;;  %p2160_p10 = scmp.lt.s32.totalorder %s323_s3, %s323_s3 }
  0x98   : > { %p2153_p5 = scmp.ne.s32.totalorder %s323_s3, %s2152_s17  ;;  %p2161_p11 = scmp.lt.s32.totalorder %s2152_s17, %s2152_s17 }
  0x9a   : > { %p2155_p7 = pnand %p2153_p5, %p2494_p8  ;;  %p2162_p12 = por %p2161_p11, %p2160_p10 }
  0x9c   : > { %p2156_p9 = pneg %p2155_p7 }
  0x9e   : > { %p2163_p4 = pnand %p2162_p12, %p2156_p9 }
  0xa0   : > { %2166 = shalt.err (!%p2163_p4)
}
  0xa1   : > { %1852 = dma.hbm_to_vmem [thread:$0]  (!%p2480_p6), %s2927_s4, 1024, %s323_s3, [#allocation9], %s2372_s18, %s2372_s18, %s2373_s26  }
  0xa2   : > { %s2167_s27 = scalar_lea.hbm %s2929_s6, 1024 }
  0xa3   : > { %p2168_p1 = scmp.ne.s32.totalorder %s2929_s6, %s2167_s27  ;;  %p2174_p0 = scmp.lt.u32.totalorder %s2167_s27, %s2929_s6 }
  0xa5   : > { %p2170_p3 = pnand %p2168_p1, %p2494_p8 }
  0xa7   : > { %p2171_p13 = pneg %p2170_p3 }
  0xa9   : > { %p2176_p2 = pnand %p2174_p0, %p2171_p13 }
  0xab   : > { %2179 = shalt.err (!%p2176_p2)
}
  0xac   : > { %s2180_s24 = scalar_lea.vmem %s349_s20, 1024  ;;  %p2188_p10 = scmp.lt.s32.totalorder %s349_s20, %s349_s20 }
  0xad   : > { %p2181_p5 = scmp.ne.s32.totalorder %s349_s20, %s2180_s24  ;;  %p2189_p11 = scmp.lt.s32.totalorder %s2180_s24, %s2180_s24 }
  0xaf   : > { %p2183_p7 = pnand %p2181_p5, %p2494_p8  ;;  %p2190_p12 = por %p2189_p11, %p2188_p10 }
  0xb1   : > { %p2184_p9 = pneg %p2183_p7 }
  0xb3   : > { %p2191_p4 = pnand %p2190_p12, %p2184_p9 }
  0xb5   : > { %2194 = shalt.err (!%p2191_p4)
}
  0xb6   : > { %1858 = dma.hbm_to_vmem [thread:$0]  (!%p2480_p6), %s2929_s6, 1024, %s349_s20, [#allocation12], %s2372_s18, %s2372_s18, %s2373_s26  }
  0xb7   : > { %s2378_s17 = smov [#allocation16]   ;;  %s2379_s25 = smov [#allocation17]  }
  0xb8   : > { %s374_s22 = sshll.u32 %s2378_s17, 4  ;;  %s388_s1 = sshll.u32 %s2379_s25, 4  ;;  %s375_s22 = int_to_ptr.vmem [resolvable:$true] %s374_s22  ;;  %s389_s1 = int_to_ptr.vmem [resolvable:$true] %s388_s1 }
  0xb9   : > { %s2195_s28 = scalar_lea.hbm %s2931_s8, 1024 }
  0xba   : > { %p2196_p1 = scmp.ne.s32.totalorder %s2931_s8, %s2195_s28  ;;  %p2202_p0 = scmp.lt.u32.totalorder %s2195_s28, %s2931_s8 }
  0xbc   : > { %p2198_p3 = pnand %p2196_p1, %p2494_p8 }
  0xbe   : > { %p2199_p13 = pneg %p2198_p3 }
  0xc0   : > { %p2204_p2 = pnand %p2202_p0, %p2199_p13 }
  0xc2   : > { %2207 = shalt.err (!%p2204_p2)
}
  0xc3   : > { %s2208_s20 = scalar_lea.vmem %s375_s22, 1024  ;;  %p2216_p10 = scmp.lt.s32.totalorder %s375_s22, %s375_s22 }
  0xc4   : > { %p2209_p5 = scmp.ne.s32.totalorder %s375_s22, %s2208_s20  ;;  %p2217_p11 = scmp.lt.s32.totalorder %s2208_s20, %s2208_s20 }
  0xc6   : > { %p2211_p7 = pnand %p2209_p5, %p2494_p8  ;;  %p2218_p12 = por %p2217_p11, %p2216_p10 }
  0xc8   : > { %p2212_p9 = pneg %p2211_p7 }
  0xca   : > { %p2219_p4 = pnand %p2218_p12, %p2212_p9 }
  0xcc   : > { %2222 = shalt.err (!%p2219_p4)
}
  0xcd   : > { %1864 = dma.hbm_to_vmem [thread:$0]  (!%p2480_p6), %s2931_s8, 1024, %s375_s22, [#allocation15], %s2372_s18, %s2372_s18, %s2373_s26  }
  0xce   : > { %s2223_s10 = scalar_lea.hbm %s2932_s9, 16 }
  0xcf   : > { %p2224_p1 = scmp.ne.s32.totalorder %s2932_s9, %s2223_s10  ;;  %p2230_p0 = scmp.lt.u32.totalorder %s2223_s10, %s2932_s9 }
  0xd1   : > { %p2226_p3 = pnand %p2224_p1, %p2494_p8 }
  0xd3   : > { %p2227_p13 = pneg %p2226_p3 }
  0xd5   : > { %p2232_p2 = pnand %p2230_p0, %p2227_p13 }
  0xd7   : > { %2235 = shalt.err (!%p2232_p2)
}
  0xd8   : > { %s2236_s21 = scalar_lea.vmem %s389_s1, 16  ;;  %s2243_s22 = scalar_lea.vmem %s389_s1, 32 }
  0xd9   : > { %p2237_p5 = scmp.ne.s32.totalorder %s389_s1, %s2236_s21  ;;  %p2244_p10 = scmp.lt.s32.totalorder %s389_s1, %s389_s1 }
  0xda   : > { %p2245_p11 = scmp.lt.s32.totalorder %s2243_s22, %s2236_s21 }
  0xdb   : > { %p2239_p7 = pnand %p2237_p5, %p2494_p8 }
  0xdc   : > { %p2246_p12 = por %p2245_p11, %p2244_p10 }
  0xdd   : > { %p2240_p9 = pneg %p2239_p7 }
  0xdf   : > { %p2247_p4 = pnand %p2246_p12, %p2240_p9 }
  0xe1   : > { %2250 = shalt.err (!%p2247_p4)
}
  0xe2   : > { %1867 = dma.hbm_to_vmem [thread:$0]  (!%p2480_p6), %s2932_s9, 16, %s389_s1, [#allocation18]  }
  0xe3   : > { %s1522_s11 = sadd.s32 4294967294, %s2367_s16   ;;  %s2687_s23 = sadd.s32 1, %s2367_s16  }
  0xe4   : > { %s38_s3 = sadd.s32 1, %s2363_s15  ;;  %s35_s30 = ssub.s32 %s2367_s16, %s2687_s23 }
  0xe5   : > { %p45_p8 = scmp.ne.s32.totalorder %s2363_s15, %s2359_s14  ;;  %p36_p1 = scmp.eq.s32.totalorder %s35_s30, 0 }
  0xe6   : > { %p46_p3 = scmp.eq.s32.totalorder %s2367_s16, 0  ;;  %p51_p13 = scmp.ne.s32.totalorder %s2359_s14, %s2355_s13 }
  0xe7   : > { %p264_p0 = scmp.eq.s32.totalorder %s2462_s19, 1  ;;  %p2948_p5 = scmp.eq.s32.totalorder %s2462_s19, 0 }
  0xe8   : > { %s2699_s17 = scalar_select %p36_p1, %s2363_s15, %s38_s3  }
  0xe9   : > { %p47_p2 = por %p46_p3, %p45_p8  ;;  %p2703_p7 = por %p2948_p5, %p51_p13 }
  0xea   : > { %p2707_p6 = por %p264_p0, %p45_p8  ;;  %p270_p9 = scmp.eq.s32.totalorder %s1522_s11, 1 }
  0xeb   : > { %p1885_p10 = scmp.lt.s32.totalorder %s2367_s16, 2  ;;  %s399_s10 = sand.u32 1, %s2363_s15  }
  0xec   : > { %s2950_s1 = scalar_select %p2707_p6, 1, 0 }
  0xed   : > { %p2713_p11 = por %p270_p9, %p51_p13  ;;  %s1534_s28 = sshll.u32 %s399_s10, 4 }
  0xee   : > { %s1603_s29 = sshll.u32 %s2367_s16, 8  ;;  %s403_s24 = scalar_lea.vmem [#allocation2], %s1534_s28 }
  0xef   : > { %s2951_s27 = scalar_select %p2713_p11, 1, 0 }
  0xf0   : > { %s2721_s22 = scalar_lea.hbm %s2923_s0, %s1603_s29  ;;  %s411_s20 = sshll.u32 %s403_s24, 4  ;;  %s2727_s20 = int_to_ptr.vmem [resolvable:$true] %s411_s20 }
  0xf1   : > { %p2723_p12 = pnand %p1885_p10, %p47_p2  ;;  %s2729_s3 = scalar_lea.sflag [#allocation3], %s399_s10 }
  0xf2   : > { %s2251_s30 = scalar_lea.hbm %s2721_s22, 256  ;;  %s2256_s12 = scalar_lea.hbm %s2923_s0, 512 }
  0xf3   : > { %p2252_p4 = scmp.ne.s32.totalorder %s2721_s22, %s2251_s30  ;;  %p2253_p8 = pneg %p2723_p12 }
  0xf4   : > { %p2257_p13 = scmp.lt.u32.totalorder %s2721_s22, %s2923_s0  ;;  %p2258_p0 = scmp.lt.u32.totalorder %s2256_s12, %s2251_s30 }
  0xf5   : > { %p2254_p1 = pnand %p2253_p8, %p2252_p4  ;;  %p2260_p5 = scmp.lt.u32.totalorder %s2251_s30, %s2721_s22 }
  0xf6   : > { %p2259_p2 = por %p2258_p0, %p2257_p13 }
  0xf7   : > { %p2255_p3 = pneg %p2254_p1 }
  0xf8   : > { %p2261_p9 = por %p2260_p5, %p2259_p2 }
  0xfa   : > { %p2262_p10 = pnand %p2261_p9, %p2255_p3 }
  0xfc   : > { %2265 = shalt.err (!%p2262_p10)
}
  0xfd   : > { %s2266_s10 = scalar_lea.vmem %s2727_s20, 256  ;;  %s2380_s28 = smov [#allocation2]  }
  0xfe   : > { %p2267_p4 = scmp.ne.s32.totalorder %s2727_s20, %s2266_s10  ;;  %s2271_s29 = sshll.u32 %s2380_s28, 4  ;;  %s2272_s29 = int_to_ptr.vmem [resolvable:$false] %s2271_s29 }
  0xff   : > { %s2273_s21 = scalar_lea.vmem %s2272_s29, 512  ;;  %p2274_p6 = scmp.lt.s32.totalorder %s2727_s20, %s2272_s29 }
 0x100   : > { %p2269_p1 = pnand %p2267_p4, %p2253_p8  ;;  %p2275_p13 = scmp.lt.s32.totalorder %s2273_s21, %s2266_s10 }
 0x102   : > { %p2270_p11 = pneg %p2269_p1  ;;  %p2276_p0 = por %p2275_p13, %p2274_p6 }
 0x104   : > { %p2277_p2 = pnand %p2276_p0, %p2270_p11 }
 0x106   : > { %2280 = shalt.err (!%p2277_p2)
}
 0x107   : > { %1871 = dma.hbm_to_vmem [thread:$0]  (!%p2723_p12), %s2721_s22, 256, %s2727_s20, %s2729_s3, %s2372_s18, %s2372_s18, %s2373_s26  }
 0x108   : > { %s2953_s30 = sld [smem:[#allocation27_spill]] }
 0x10e   : > { %p2954_p8 = scmp.ne.s32.totalorder %s2953_s30, 0 }
 0x10f   : > { %s2763_s12 = sand.u32 (!%p2954_p8), 1, %s2359_s14  }
 0x110   : > { %423 = sbr.rel (%p2954_p8) target bundleno = 2067 (0x813), region = 60  ;;  %s1539_s24 = sshll.u32 (!%p2954_p8), %s2763_s12, 4 }
 0x111   : > { %s426_s10 = scalar_lea.sflag (!%p2954_p8), [#allocation3], %s2763_s12  ;;  %s429_s28 = scalar_lea.vmem (!%p2954_p8), [#allocation2], %s1539_s24 }
 0x117   : > { %2326 = dma.done.wait (%p2703_p7), %s426_s10, 256  }
 0x118   : > { %2328 = vsyncadd (%p2703_p7), %s426_s10, 4294967040  ;;  %p2955_p6 = scmp.eq.s32.totalorder %s2462_s19, 0 }
 0x11a   : > { %2330 = dma.done.wait (%p2955_p6), [#allocation6], 32   ;;  %p2956_p11 = pmov %p2955_p6 }
 0x11b   : > { %p2957_p12 = pmov %p2955_p6 }
 0x11c   : > { %2332 = vsyncadd (%p2956_p11), [#allocation6], 4294967264 }
 0x11d   : > { %2334 = dma.done.wait (%p2957_p12), [#allocation9], 1088   ;;  %p2958_p3 = pmov %p2955_p6 }
 0x11f   : > { %2336 = vsyncadd (%p2958_p3), [#allocation9], 4294966208  ;;  %p2959_p5 = pmov %p2958_p3 }
 0x120   : > { %p2960_p9 = pmov %p2958_p3 }
 0x121   : > { %2338 = dma.done.wait (%p2959_p5), [#allocation12], 2048  }
 0x122   : > { %2340 = vsyncadd (%p2960_p9), [#allocation12], 4294965248  ;;  %p2961_p7 = pmov %p2958_p3 }
 0x123   : > { %p2962_p10 = pmov %p2958_p3 }
 0x124   : > { %2342 = dma.done.wait (%p2961_p7), [#allocation15], 2048  }
 0x125   : > { %2344 = vsyncadd (%p2962_p10), [#allocation15], 4294965248  ;;  %p2963_p4 = pmov %p2958_p3 }
 0x126   : > { %p2964_p1 = pmov %p2958_p3 }
 0x127   : > { %2346 = dma.done.wait (%p2963_p4), [#allocation18], 16  }
 0x128   : > { %2348 = vsyncadd (%p2964_p1), [#allocation18], 4294967280  ;;  %v1608_v0 = vld [vmem:[%s429_s28] sm:$0xff]   ;;  %v1620_v1 = vld [vmem:[%s429_s28 + $0x8] sm:$0xff]   ;;  %v2381_v38 = vmov 0.0   ;;  %vm2382_vm0 = vmmov 0  }
 0x129   : > { %v1609_v2 = vunpack.c.l.bf16 %v1608_v0  ;;  %v1613_v3 = vunpack.c.l.bf16 %v1620_v1  ;;  %v1610_v4 = vunpack.c.h.bf16 %v1608_v0  ;;  %v1614_v5 = vunpack.c.h.bf16 %v1620_v1  ;;  %v1943_v6 = vld [vmem:[#allocation11] sm:$0xff]   ;;  %v1945_v24 = vld [vmem:[#allocation11 + $0x8] sm:$0xff]   ;;  %v1947_v26 = vld [vmem:[#allocation11 + $0x10] sm:$0xff]   ;;  %s1549_s18 = sshll.u32 %s2763_s12, 3  ;;  %s1606_s22 = sshll.u32 %s2462_s19, 7 }
 0x12a   : > { %v1944_v7 = vld [vmem:[#allocation13] sm:$0xff]   ;;  %1676 = vmatprep.subr.bf16.mxu0 %v1943_v6  ;;  %v1946_v25 = vld [vmem:[#allocation13 + $0x8] sm:$0xff]   ;;  %v1948_v27 = vld [vmem:[#allocation13 + $0x10] sm:$0xff]   ;;  %vm998_vm1 = vcmask 130048   ;;  %s501_s26 = scalar_lea.vmem [#allocation19], %s1549_s18  ;;  %s2965_s3 = sld [smem:[#allocation30_spill]] }
 0x12b   : > { %513 = vadd.xlane.f32.xlu0 %v1609_v2  ;;  %517 = vadd.xlane.f32.xlu1 %v1613_v3  ;;  %v1949_v28 = vld [vmem:[#allocation11 + $0x18] sm:$0xff]   ;;  %v1951_v30 = vld [vmem:[#allocation11 + $0x20] sm:$0xff]   ;;  %v1953_v32 = vld [vmem:[#allocation11 + $0x28] sm:$0xff]   ;;  %s1363_s25 = sshll.u32 %s501_s26, 4  ;;  %s1350_s21 = scalar_lea.sflag [#allocation4], %s2763_s12  ;;  %s2874_s25 = int_to_ptr.vmem [resolvable:$true] %s1363_s25 }
 0x12c   : > { %1696 = vmatprep.subr.bf16.mxu1 %v1944_v7  ;;  %1677 = vmatpush3.bf16.msra.mxu0 %v1943_v6  ;;  %v1950_v29 = vld [vmem:[#allocation13 + $0x18] sm:$0xff]   ;;  %v1952_v31 = vld [vmem:[#allocation13 + $0x20] sm:$0xff]   ;;  %v1954_v33 = vld [vmem:[#allocation13 + $0x28] sm:$0xff]   ;;  %s2281_s30 = scalar_lea.vmem %s2874_s25, 128  ;;  %p2966_p0 = scmp.ne.s32.totalorder %s2950_s1, 0 }
 0x12d   : > { %1697 = vmatpush3.bf16.msra.mxu1 %v1944_v7  ;;  %1678 = vmatprep.subr.bf16.mxu0 %v1945_v24  ;;  %v1955_v34 = vld [vmem:[#allocation11 + $0x30] sm:$0xff]   ;;  %v1957_v36 = vld [vmem:[#allocation11 + $0x38] sm:$0xff]   ;;  %v1959_v6 = vld [vmem:[#allocation10] sm:$0xff]   ;;  %p2282_p13 = scmp.ne.s32.totalorder %s2874_s25, %s2281_s30  ;;  %s2383_s19 = smov [#allocation19]  }
 0x12e   : > { %1698 = vmatprep.subr.bf16.mxu1 %v1946_v25  ;;  %v1956_v35 = vld [vmem:[#allocation13 + $0x30] sm:$0xff]   ;;  %v1958_v37 = vld [vmem:[#allocation13 + $0x38] sm:$0xff]   ;;  %s2285_s24 = sshll.u32 %s2383_s19, 4  ;;  %s2286_s24 = int_to_ptr.vmem [resolvable:$false] %s2285_s24 }
 0x12f   : > { %515 = vadd.xlane.f32.xlu0 %v1610_v4  ;;  %519 = vadd.xlane.f32.xlu1 %v1614_v5  ;;  %v1550_v53 = vld [vmem:[#allocation5] ss:$0 sm:$0xff]  ;;  %v1551_v58 = vld [vmem:[#allocation7] ss:$0 sm:$0xff]  ;;  %p2283_p2 = pnand %p2282_p13, %p2966_p0  ;;  %s2287_s10 = scalar_lea.vmem %s2286_s24, 256 }
 0x130   : > { %1679 = vmatpush3.bf16.msra.mxu0 %v1945_v24  ;;  %s2879_s29 = scalar_lea.hbm %s2965_s3, %s1606_s22  ;;  %p2288_p6 = scmp.lt.s32.totalorder %s2874_s25, %s2286_s24 }
 0x131   : > { %1699 = vmatpush3.bf16.msra.mxu1 %v1946_v25  ;;  %1680 = vmatprep.subr.bf16.mxu0 %v1947_v26  ;;  %p2284_p8 = pneg %p2283_p2  ;;  %p2289_p11 = scmp.lt.s32.totalorder %s2287_s10, %s2281_s30 }
 0x132   : > { %1700 = vmatprep.subr.bf16.mxu1 %v1948_v27 }
 0x133   : > { %p2290_p12 = por %p2289_p11, %p2288_p6 }
 0x134   : > { %1681 = vmatpush3.bf16.msra.mxu0 %v1947_v26 }
 0x135   : > { %1701 = vmatpush3.bf16.msra.mxu1 %v1948_v27  ;;  %1682 = vmatprep.subr.bf16.mxu0 %v1949_v28  ;;  %p2291_p3 = pnand %p2290_p12, %p2284_p8 }
 0x136   : > { %1702 = vmatprep.subr.bf16.mxu1 %v1950_v29 }
 0x138   : > { %1683 = vmatpush3.bf16.msra.mxu0 %v1949_v28 }
 0x139   : > { %1703 = vmatpush3.bf16.msra.mxu1 %v1950_v29  ;;  %1684 = vmatprep.subr.bf16.mxu0 %v1951_v30 }
 0x13a   : > { %1704 = vmatprep.subr.bf16.mxu1 %v1952_v31 }
 0x13c   : > { %1685 = vmatpush3.bf16.msra.mxu0 %v1951_v30 }
 0x13d   : > { %1705 = vmatpush3.bf16.msra.mxu1 %v1952_v31  ;;  %1686 = vmatprep.subr.bf16.mxu0 %v1953_v32 }
 0x13e   : > { %1706 = vmatprep.subr.bf16.mxu1 %v1954_v33 }
 0x140   : > { %1687 = vmatpush3.bf16.msra.mxu0 %v1953_v32 }
 0x141   : > { %1707 = vmatpush3.bf16.msra.mxu1 %v1954_v33  ;;  %1688 = vmatprep.subr.bf16.mxu0 %v1955_v34 }
 0x142   : > { %1708 = vmatprep.subr.bf16.mxu1 %v1956_v35 }
 0x144   : > { %1689 = vmatpush3.bf16.msra.mxu0 %v1955_v34 }
 0x145   : > { %1709 = vmatpush3.bf16.msra.mxu1 %v1956_v35  ;;  %1690 = vmatprep.subr.bf16.mxu0 %v1957_v36 }
 0x146   : > { %1710 = vmatprep.subr.bf16.mxu1 %v1958_v37 }
 0x148   : > { %1691 = vmatpush3.bf16.msra.mxu0 %v1957_v36 }
 0x149   : > { %1711 = vmatpush3.bf16.msra.mxu1 %v1958_v37  ;;  %1716 = vmatprep.subr.bf16.mxu0 %v2381_v38 }
 0x14a   : > { %1736 = vmatprep.subr.bf16.mxu1 %v2381_v38 }
 0x1b8   : > { %v514_v8 = vpop.xlane.xlu0 %513  ;;  %v518_v9 = vpop.xlane.xlu1 %517 }
 0x1b9   : > { %v522_v10 = vmul.f32 0.0078125, %v514_v8  ;;  %v524_v11 = vmul.f32 0.0078125, %v518_v9  ;;  %v1960_v8 = vld [vmem:[#allocation10 + $0x8] sm:$0xff]   ;;  %v1961_v9 = vld [vmem:[#allocation10 + $0x10] sm:$0xff]  }
 0x1bb   : > { %v2791_v12 = vsub.f32 %v1609_v2, %v522_v10  ;;  %v2793_v13 = vsub.f32 %v1613_v3, %v524_v11  ;;  %v1962_v10 = vld [vmem:[#allocation10 + $0x18] sm:$0xff]   ;;  %v1963_v11 = vld [vmem:[#allocation10 + $0x20] sm:$0xff]  }
 0x1bc   : > { %v516_v14 = vpop.xlane.xlu0 %515  ;;  %v520_v15 = vpop.xlane.xlu1 %519 }
 0x1bd   : > { %v523_v16 = vmul.f32 0.0078125, %v516_v14  ;;  %v530_v17 = vmul.f32 %v2791_v12, %v2791_v12  ;;  %v525_v18 = vmul.f32 0.0078125, %v520_v15  ;;  %v532_v21 = vmul.f32 %v2793_v13, %v2793_v13  ;;  %v1966_v14 = vld [vmem:[#allocation10 + $0x38] sm:$0xff]  }
 0x1be   : > { %v2824_v15 = vld [vmem:[#allocation8] sm:$0xf] }
 0x1bf   : > { %v2797_v19 = vsub.f32 %v1610_v4, %v523_v16  ;;  %534 = vadd.xlane.f32.xlu0 %v530_v17  ;;  %v2799_v20 = vsub.f32 %v1614_v5, %v525_v18 }
 0x1c1   : > { %v531_v22 = vmul.f32 %v2797_v19, %v2797_v19  ;;  %v533_v23 = vmul.f32 %v2799_v20, %v2799_v20 }
 0x1c3   : > { %538 = vadd.xlane.f32.xlu0 %v532_v21  ;;  %536 = vadd.xlane.f32.xlu1 %v531_v22 }
 0x1c7   : > { %540 = vadd.xlane.f32.xlu1 %v533_v23 }
 0x24c   : > { %v535_v39 = vpop.xlane.xlu0 %534 }
 0x24d   : > { %v542_v40 = vmul.f32 0.0078125, %v535_v39 }
 0x24f   : > { %v546_v41 = vadd.f32 1e-05, %v542_v40 }
 0x250   : > { %v537_v42 = vpop.xlane.xlu1 %536  ;;  %v539_v43 = vpop.xlane.xlu0 %538 }
 0x251   : > { %1983 = vrsqrt.f32 %v546_v41  ;;  %v543_v44 = vmul.f32 0.0078125, %v537_v42  ;;  %v544_v45 = vmul.f32 0.0078125, %v539_v43 }
 0x253   : > { %v547_v46 = vadd.f32 1e-05, %v543_v44  ;;  %v548_v47 = vadd.f32 1e-05, %v544_v45 }
 0x254   : > { %v541_v48 = vpop.xlane.xlu1 %540 }
 0x255   : > { %1985 = vrsqrt.f32 %v547_v46  ;;  %v545_v49 = vmul.f32 0.0078125, %v541_v48 }
 0x256   : > { %1987 = vrsqrt.f32 %v548_v47 }
 0x257   : > { %v549_v50 = vadd.f32 1e-05, %v545_v49 }
 0x259   : > { %1989 = vrsqrt.f32 %v549_v50 }
 0x25b   : > { %v1984_v51 = vpop.eup %1983 }
 0x25c   : > { %v554_v52 = vmul.f32 %v1984_v51, %v2791_v12  ;;  %v1964_v12 = vld [vmem:[#allocation10 + $0x28] sm:$0xff]  }
 0x25e   : > { %v565_v57 = vmul.f32 %v1550_v53, %v554_v52 }
 0x25f   : > { %v1986_v54 = vpop.eup %1985 }
 0x260   : > { %v1988_v55 = vpop.eup %1987  ;;  %v555_v56 = vmul.f32 %v1986_v54, %v2797_v19  ;;  %v576_v62 = vadd.f32 %v1551_v58, %v565_v57  ;;  %v1967_v54 = vld [vmem:[#allocation14] sm:$0xff]   ;;  %v1970_v57 = vld [vmem:[#allocation14 + $0x18] sm:$0xff]  }
 0x261   : > { %v556_v59 = vmul.f32 %v1988_v55, %v2793_v13  ;;  %v1965_v13 = vld [vmem:[#allocation10 + $0x30] sm:$0xff]   ;;  %v1968_v55 = vld [vmem:[#allocation14 + $0x8] sm:$0xff]  }
 0x262   : > { %v566_v60 = vmul.f32 %v1550_v53, %v555_v56  ;;  %v1969_v56 = vld [vmem:[#allocation14 + $0x10] sm:$0xff]  }
 0x263   : > { %v1990_v61 = vpop.eup %1989  ;;  %v567_v1 = vmul.f32 %v1550_v53, %v556_v59 }
 0x264   : > { %v577_v63 = vadd.f32 %v1551_v58, %v566_v60  ;;  %v557_v0 = vmul.f32 %v1990_v61, %v2799_v20 }
 0x265   : > { %v578_v4 = vadd.f32 %v1551_v58, %v567_v1 }
 0x266   : > { %v580_v2 = vpack.c.bf16 %v577_v63, %v576_v62  ;;  %v568_v3 = vmul.f32 %v1550_v53, %v557_v0 }
 0x268   : > { %1692 = vmatprep.mubr.bf16.mxu0 %v580_v2  ;;  %1712 = vmatprep.mubr.bf16.mxu1 %v580_v2  ;;  %v579_v5 = vadd.f32 %v1551_v58, %v568_v3  ;;  %v1971_v58 = vld [vmem:[#allocation14 + $0x20] sm:$0xff]   ;;  %v1972_v3 = vld [vmem:[#allocation14 + $0x28] sm:$0xff]  }
 0x26a   : > { %v581_v7 = vpack.c.bf16 %v579_v5, %v578_v4  ;;  %v1973_v4 = vld [vmem:[#allocation14 + $0x30] sm:$0xff]   ;;  %v1974_v5 = vld [vmem:[#allocation14 + $0x38] sm:$0xff]  }
 0x26c   : > { %1693 = vmatmul.mubr.bf16.vlgmr.msra.gmra.mrb[0].mxu0 %v581_v7  ;;  %1713 = vmatmul.mubr.bf16.vlgmr.msra.gmra.mrb[0].mxu1 %v581_v7  ;;  %v1976_v7 = vld [vmem:[#allocation16 + $0x8] sm:$0xff]  }
 0x26d   : > { %1717 = vmatpush3.bf16.msra.mxu0 %v1959_v6  ;;  %1732 = vmatprep.mubr.msk.bf16.mxu0 %vm2382_vm0, %v2381_v38  ;;  %v1975_v6 = vld [vmem:[#allocation16] sm:$0xff]  }
 0x26e   : > { %1718 = vmatprep.subr.bf16.mxu0 %v2381_v38  ;;  %1738 = vmatprep.mubr.msk.bf16.mxu1 %vm2382_vm0, %v2381_v38 }
 0x271   : > { %1719 = vmatpush3.bf16.msra.mxu0 %v1960_v8  ;;  %v1977_v8 = vld [vmem:[#allocation16 + $0x10] sm:$0xff]  }
 0x272   : > { %1720 = vmatprep.subr.bf16.mxu0 %v2381_v38 }
 0x275   : > { %1721 = vmatpush3.bf16.msra.mxu0 %v1961_v9  ;;  %v1978_v9 = vld [vmem:[#allocation16 + $0x18] sm:$0xff]  }
 0x276   : > { %1722 = vmatprep.subr.bf16.mxu0 %v2381_v38 }
 0x279   : > { %1723 = vmatpush3.bf16.msra.mxu0 %v1962_v10  ;;  %v1979_v10 = vld [vmem:[#allocation16 + $0x20] sm:$0xff]  }
 0x27a   : > { %1724 = vmatprep.subr.bf16.mxu0 %v2381_v38 }
 0x27d   : > { %1725 = vmatpush3.bf16.msra.mxu0 %v1963_v11  ;;  %v1980_v11 = vld [vmem:[#allocation16 + $0x28] sm:$0xff]  }
 0x27e   : > { %1726 = vmatprep.subr.bf16.mxu0 %v2381_v38 }
 0x281   : > { %1727 = vmatpush3.bf16.msra.mxu0 %v1964_v12 }
 0x282   : > { %1728 = vmatprep.subr.bf16.mxu0 %v2381_v38 }
 0x285   : > { %1729 = vmatpush3.bf16.msra.mxu0 %v1965_v13 }
 0x286   : > { %1730 = vmatprep.subr.bf16.mxu0 %v2381_v38 }
 0x289   : > { %1731 = vmatpush3.bf16.msra.mxu0 %v1966_v14 }
 0x28a   : > { %1760 = vmatprep.subr.bf16.mxu0 %v2381_v38 }
 0x28c   : > { %1733 = vmatmul.mubr.bf16.vlgmr.msra.gmra.mrb[4].mxu0 %v2824_v15 }
 0x28d   : > { %1776 = vmatprep.mubr.msk.bf16.mxu0 %vm2382_vm0, %v2381_v38  ;;  %1761 = vmatpush3.bf16.msra.mxu0 %v1967_v54 }
 0x28e   : > { %1762 = vmatprep.subr.bf16.mxu0 %v2381_v38 }
 0x291   : > { %1763 = vmatpush3.bf16.msra.mxu0 %v1968_v55 }
 0x292   : > { %1764 = vmatprep.subr.bf16.mxu0 %v2381_v38 }
 0x295   : > { %1765 = vmatpush3.bf16.msra.mxu0 %v1969_v56 }
 0x296   : > { %1766 = vmatprep.subr.bf16.mxu0 %v2381_v38 }
 0x299   : > { %1767 = vmatpush3.bf16.msra.mxu0 %v1970_v57 }
 0x29a   : > { %1768 = vmatprep.subr.bf16.mxu0 %v2381_v38 }
 0x29d   : > { %1769 = vmatpush3.bf16.msra.mxu0 %v1971_v58 }
 0x29e   : > { %1770 = vmatprep.subr.bf16.mxu0 %v2381_v38 }
 0x2a1   : > { %1771 = vmatpush3.bf16.msra.mxu0 %v1972_v3 }
 0x2a2   : > { %1772 = vmatprep.subr.bf16.mxu0 %v2381_v38 }
 0x2a5   : > { %1773 = vmatpush3.bf16.msra.mxu0 %v1973_v4 }
 0x2a6   : > { %1774 = vmatprep.subr.bf16.mxu0 %v2381_v38 }
 0x2a9   : > { %1775 = vmatpush3.bf16.msra.mxu0 %v1974_v5 }
 0x33f   : > { %v1694_v16 = vpop.f32.mrb[0].mxu0  ;;  %v2830_v17 = vpop.f32.mrb[0].mxu1 }
 0x340   : > { %v680_v18 = vpop.f32.mrb[1].mxu0  ;;  %v793_v19 = vpop.f32.mrb[1].mxu1 }
 0x341   : > { %v1695_v20 = vpop.f32.mrb[2].mxu0  ;;  %v2832_v21 = vpop.f32.mrb[2].mxu1 }
 0x342   : > { %v809_v22 = vpack.c.bf16 %v1695_v20, %v1694_v16  ;;  %v811_v23 = vpack.c.bf16 %v2832_v21, %v2830_v17  ;;  %v683_v24 = vpop.f32.mrb[3].mxu0  ;;  %v796_v25 = vpop.f32.mrb[3].mxu1 }
 0x343   : > { %v808_v26 = vpack.c.bf16 %v683_v24, %v680_v18  ;;  %v810_v27 = vpack.c.bf16 %v796_v25, %v793_v19  ;;  %v1222_v24 = vunpack.c.l.bf16 %v2824_v15 }
 0x345   : > { %1737 = vmatpush3.bf16.xpose.msra.mxu1 %v808_v26 }
 0x346   : > { %1742 = vmatprep.subr.bf16.mxu1 %v2381_v38 }
 0x35f   : > { %v911_v28 = vpop.f32.mrb[4].mxu0 }
 0x360   : > { %v917_v29 = vpack.c.bf16 %v911_v28, %v911_v28  ;;  %v1734_v30 = vpop.f32.mrb[5].mxu0 }
 0x361   : > { %v914_v31 = vpop.f32.mrb[6].mxu0 }
 0x362   : > { %v1735_v32 = vpop.f32.mrb[7].mxu0  ;;  %1739 = vmatmul.mubr.bf16.vlgmr.msra.gmra.mrb[4].mxu1 %v917_v29 }
 0x363   : > { %1743 = vmatpush3.bf16.xpose.msra.mxu1 %v809_v22  ;;  %1744 = vmatprep.mubr.msk.bf16.mxu1 %vm2382_vm0, %v2381_v38  ;;  %v1981_v22 = vld [vmem:[#allocation16 + $0x30] sm:$0xff]   ;;  %v1587_v32 = vld [vmem:[#allocation17] ss:$0 sm:$0xff] }
 0x364   : > { %1748 = vmatprep.subr.bf16.mxu1 %v2381_v38 }
 0x36a   : > { %1745 = vmatmul.mubr.bf16.vlgmr.msra.gmra.mrb[8].mxu1 %v917_v29 }
 0x36b   : > { %1749 = vmatpush3.bf16.msra.mxu1 %v810_v27  ;;  %1750 = vmatprep.mubr.msk.bf16.mxu1 %vm2382_vm0, %v2381_v38 }
 0x36c   : > { %1754 = vmatprep.subr.bf16.mxu1 %v2381_v38 }
 0x435   : > { %v952_v33 = vpop.f32.mrb[4].mxu1 }
 0x436   : > { %v1740_v34 = vpop.f32.mrb[5].mxu1  ;;  %v999_v35 = vsel %vm998_vm1, %v952_v33, -inf }
 0x437   : > { %1000 = vmax.xlane.f32.xlu0 %v999_v35  ;;  %v955_v36 = vpop.f32.mrb[6].mxu1 }
 0x438   : > { %v1741_v37 = vpop.f32.mrb[7].mxu1 }
 0x43d   : > { %v992_v39 = vpop.f32.mrb[8].mxu1 }
 0x43e   : > { %v1746_v40 = vpop.f32.mrb[9].mxu1  ;;  %v1002_v41 = vsel %vm998_vm1, %v992_v39, -inf }
 0x43f   : > { %1003 = vmax.xlane.f32.xlu1 %v1002_v41  ;;  %v995_v42 = vpop.f32.mrb[10].mxu1 }
 0x440   : > { %v1747_v43 = vpop.f32.mrb[11].mxu1 }
 0x4c4   : > { %v1001_v44 = vpop.xlane.xlu0 %1000 }
 0x4c5   : > { %v1005_v45 = vsub.f32 %v952_v33, %v1001_v44 }
 0x4c7   : > { %v1007_v46 = vmul.f32 1.442695, %v1005_v45 }
 0x4c9   : > { %1991 = vpow2.f32 %v1007_v46 }
 0x4cc   : > { %v1004_v47 = vpop.xlane.xlu1 %1003 }
 0x4cd   : > { %v1006_v48 = vsub.f32 %v992_v39, %v1004_v47 }
 0x4cf   : > { %v1009_v49 = vmul.f32 1.442695, %v1006_v48 }
 0x4d1   : > { %1993 = vpow2.f32 %v1009_v49 }
 0x4d3   : > { %v1992_v50 = vpop.eup %1991 }
 0x4d4   : > { %v1011_v51 = vsel %vm998_vm1, %v1992_v50, 0.0 }
 0x4d5   : > { %1012 = vadd.xlane.f32.xlu0 %v1011_v51 }
 0x4db   : > { %v1994_v52 = vpop.eup %1993 }
 0x4dc   : > { %v1014_v53 = vsel %vm998_vm1, %v1994_v52, 0.0 }
 0x4dd   : > { %1015 = vadd.xlane.f32.xlu1 %v1014_v53 }
 0x562   : > { %v1013_v59 = vpop.xlane.xlu0 %1012 }
 0x563   : > { %1995 = vrcp.f32 %v1013_v59 }
 0x56a   : > { %v1016_v60 = vpop.xlane.xlu1 %1015 }
 0x56b   : > { %1997 = vrcp.f32 %v1016_v60 }
 0x56d   : > { %v1996_v61 = vpop.eup %1995 }
 0x56e   : > { %v1019_v62 = vmul.f32 %v1996_v61, %v1992_v50 }
 0x570   : > { %v1021_v63 = vpack.c.bf16 %v1019_v62, %v1019_v62 }
 0x572   : > { %1751 = vmatmul.mubr.msk.bf16.vlgmr.msra.gmra.mrb[12].mxu1 %vm998_vm1, %v1021_v63 }
 0x573   : > { %1755 = vmatpush3.bf16.msra.mxu1 %v811_v23  ;;  %1756 = vmatprep.mubr.msk.bf16.mxu1 %vm2382_vm0, %v2381_v38  ;;  %v1982_v23 = vld [vmem:[#allocation16 + $0x38] sm:$0xff]  }
 0x574   : > { %1780 = vmatprep.subr.bf16.mxu1 %v2381_v38 }
 0x575   : > { %v1998_v0 = vpop.eup %1997 }
 0x576   : > { %v1020_v1 = vmul.f32 %v1998_v0, %v1994_v52 }
 0x578   : > { %v1022_v2 = vpack.c.bf16 %v1020_v1, %v1020_v1 }
 0x57a   : > { %1757 = vmatmul.mubr.msk.bf16.vlgmr.msra.gmra.mrb[16].mxu1 %vm998_vm1, %v1022_v2 }
 0x57b   : > { %1796 = vmatprep.mubr.msk.bf16.mxu1 %vm2382_vm0, %v2381_v38  ;;  %1781 = vmatpush3.bf16.msra.mxu1 %v1975_v6 }
 0x57c   : > { %1782 = vmatprep.subr.bf16.mxu1 %v2381_v38 }
 0x57f   : > { %1783 = vmatpush3.bf16.msra.mxu1 %v1976_v7 }
 0x580   : > { %1784 = vmatprep.subr.bf16.mxu1 %v2381_v38 }
 0x583   : > { %1785 = vmatpush3.bf16.msra.mxu1 %v1977_v8 }
 0x584   : > { %1786 = vmatprep.subr.bf16.mxu1 %v2381_v38 }
 0x587   : > { %1787 = vmatpush3.bf16.msra.mxu1 %v1978_v9 }
 0x588   : > { %1788 = vmatprep.subr.bf16.mxu1 %v2381_v38 }
 0x58b   : > { %1789 = vmatpush3.bf16.msra.mxu1 %v1979_v10 }
 0x58c   : > { %1790 = vmatprep.subr.bf16.mxu1 %v2381_v38 }
 0x58f   : > { %1791 = vmatpush3.bf16.msra.mxu1 %v1980_v11 }
 0x590   : > { %1792 = vmatprep.subr.bf16.mxu1 %v2381_v38 }
 0x593   : > { %1793 = vmatpush3.bf16.msra.mxu1 %v1981_v22 }
 0x594   : > { %1794 = vmatprep.subr.bf16.mxu1 %v2381_v38 }
 0x597   : > { %1795 = vmatpush3.bf16.msra.mxu1 %v1982_v23 }
 0x645   : > { %v1060_v12 = vpop.f32.mrb[12].mxu1 }
 0x646   : > { %v1752_v13 = vpop.f32.mrb[13].mxu1 }
 0x647   : > { %v1063_v14 = vpop.f32.mrb[14].mxu1 }
 0x648   : > { %v1753_v16 = vpop.f32.mrb[15].mxu1 }
 0x64d   : > { %v1103_v17 = vpop.f32.mrb[16].mxu1 }
 0x64e   : > { %v1604_v18 = vpack.c.bf16 %v1103_v17, %v1060_v12  ;;  %v1758_v19 = vpop.f32.mrb[17].mxu1 }
 0x64f   : > { %v1106_v20 = vpop.f32.mrb[18].mxu1 }
 0x650   : > { %v1759_v21 = vpop.f32.mrb[19].mxu1  ;;  %1777 = vmatmul.mubr.bf16.vlgmr.msra.gmra.mrb[8].mxu0 %v1604_v18 }
 0x723   : > { %v1215_v25 = vpop.f32.mrb[8].mxu0 }
 0x724   : > { %v1778_v26 = vpop.f32.mrb[9].mxu0  ;;  %v1223_v28 = vadd.f32 %v1222_v24, %v1215_v25 }
 0x725   : > { %v1218_v27 = vpop.f32.mrb[10].mxu0 }
 0x726   : > { %v1224_v29 = vadd.f32 %v1222_v24, %v1218_v27  ;;  %v1779_v30 = vpop.f32.mrb[11].mxu0 }
 0x728   : > { %v1605_v31 = vpack.c.bf16 %v1224_v29, %v1223_v28 }
 0x72a   : > { %1797 = vmatmul.mubr.bf16.vlgmr.msra.gmra.mrb[20].mxu1 %v1605_v31 }
 0x7fd   : > { %v1338_v33 = vpop.f32.mrb[20].mxu1 }
 0x7fe   : > { %v1798_v34 = vpop.f32.mrb[21].mxu1  ;;  %v1339_v35 = vadd.f32 %v1587_v32, %v1338_v33 }
 0x7ff   : > { %v1341_v38 = vpop.f32.mrb[22].mxu1 }
 0x800   : > { %v1342_v15 = vadd.f32 %v1587_v32, %v1341_v38  ;;  %v1799_v36 = vpop.f32.mrb[23].mxu1 }
 0x802   : > { %v1618_v37 = vpack.c.bf16 %v1342_v15, %v1339_v35 }
 0x804   : > { %1619 = vst [vmem:[%s501_s26] sm:$0xff] %v1618_v37  }
 0x805   : > { %2294 = shalt.err (!%p2291_p3)
}
 0x806   : > { %s2295_s28 = scalar_lea.hbm %s2879_s29, 128  ;;  %s2299_s22 = scalar_lea.hbm %s2965_s3, 256 }
 0x807   : > { %p2296_p5 = scmp.ne.s32.totalorder %s2879_s29, %s2295_s28  ;;  %p2300_p10 = scmp.lt.u32.totalorder %s2879_s29, %s2965_s3 }
 0x808   : > { %p2301_p4 = scmp.lt.u32.totalorder %s2299_s22, %s2295_s28  ;;  %p2303_p13 = scmp.lt.u32.totalorder %s2295_s28, %s2879_s29 }
 0x809   : > { %p2297_p9 = pnand %p2296_p5, %p2966_p0 }
 0x80a   : > { %p2302_p1 = por %p2301_p4, %p2300_p10 }
 0x80b   : > { %p2298_p7 = pneg %p2297_p9 }
 0x80c   : > { %p2304_p2 = por %p2303_p13, %p2302_p1 }
 0x80e   : > { %p2305_p8 = pnand %p2304_p2, %p2298_p7 }
 0x810   : > { %2308 = shalt.err (!%p2305_p8)
}
 0x811   : > { %s2384_s30 = smov 64   ;;  %s2385_s19 = smov 4  }
 0x812   : > { %1838 = dma.vmem_to_hbm [thread:$0]  (%p2966_p0), %s2874_s25, 128, %s2879_s29, %s1350_s21, %s2384_s30, %s2384_s30, %s2385_s19  }
 0x813 PF: > { %s1378_s24 = sand.u32 1, %s2355_s13   ;;  %p2967_p6 = scmp.ne.s32.totalorder %s2951_s27, 0 }
 0x814   : > { %p2968_p11 = scmp.ge.s32.totalorder %s2367_s16, 2  ;;  %s1379_s10 = scalar_lea.sflag [#allocation4], %s1378_s24 }
 0x816   : > { %p1873_p12 = pnand %p2968_p11, %p2967_p6 }
 0x818   : > { %2350 = dma.done.wait (!%p1873_p12), %s1379_s10, 128  }
 0x819   : > { %2352 = vsyncadd (!%p1873_p12), %s1379_s10, 4294967168  ;;  %p28_p3 = scmp.ge.s32.totalorder %s2687_s23, 4   ;;  %s2969_s13 = smov %s2359_s14 }
 0x81a   : > { %s2970_s14 = smov %s2363_s15  ;;  %s2971_s15 = smov %s2699_s17 }
 0x81b   : > { %s2972_s16 = smov %s2687_s23  ;;  %30 = sbr.rel (!%p28_p3) target bundleno = 14 (0xe), region = 141 }
 0x822   :  { %1384 = vsyncpa [#allocation3], 1 }
 0x823   :  { %1386 = vsyncpa [#allocation3 + $0x1], 1 }
 0x824   :  { %1387 = vsyncpa [#allocation6], 1 }
 0x825   :  { %1388 = vsyncpa [#allocation9], 1 }
 0x826   :  { %1389 = vsyncpa [#allocation12], 1 }
 0x827   :  { %1390 = vsyncpa [#allocation15], 1 }
 0x828   :  { %1391 = vsyncpa [#allocation18], 1 }
 0x829   :  { %1392 = vsyncpa [#allocation4], 1 }
 0x82a   :  { %1394 = vsyncpa [#allocation4 + $0x1], 1 }

</bundles_post_ra>
